<compile_context>
chip_gen: v7x
topology: tpu7x:2x2x1
jax: 0.10.0
libtpu: 0.0.40
codegen_flags: <defaults>
</compile_context>

<pallas_src>
import math
import functools
import jax
import jax.numpy as jnp
from jax.experimental import pallas as pl
from jax.experimental.pallas import tpu as pltpu

# ---- model hyperparameters (match PyTorch defaults) -------------------------
X_DIM = 3
Y_DIM = 2
HIDDEN_DIM = 32
LATENT_DIM = 32
USE_DETERMINISTIC_PATH = True
MIN_STD = 0.01
HIDDEN_DIM_2 = (2 * HIDDEN_DIM + LATENT_DIM) if USE_DETERMINISTIC_PATH else (HIDDEN_DIM + LATENT_DIM)

TM_MAX = 1024  # max row tile (multiple of 128); per-tile VMEM ~4 MiB at f32


def _round_up(x, m):
    return ((x + m - 1) // m) * m


def _choose_tm(M, tm_max=TM_MAX):
    """Adaptive row tile: big tiles for big M, no huge padding for small M,
    and >=2 grid steps when possible (keeps both v7x TensorCores busy)."""
    m128 = _round_up(max(M, 1), 128)
    if m128 <= 128:
        return 128
    tm = min(tm_max, m128)
    if tm >= m128:  # would be a single grid step -> halve for megacore
        tm = _round_up(m128 // 2, 128)
    return max(tm, 128)


def _decoder_kernel(r_ref, z_ref, x_ref,
                    w0r_ref, w0z_ref, w0x_ref,
                    wstk_ref, bstk_ref, wh_ref, bh_ref,
                    out_ref, *, compute_dtype):
    cd = compute_dtype  # operands cast right before each matmul only (v5e-safe)

    # fused layer 0 (target transform folded into w0x / b0f) + ReLU
    h = jnp.dot(r_ref[...].astype(cd), w0r_ref[...],
                preferred_element_type=jnp.float32)
    h = h + jnp.dot(z_ref[...].astype(cd), w0z_ref[...],
                    preferred_element_type=jnp.float32)
    h = h + jnp.dot(x_ref[...].astype(cd), w0x_ref[...],
                    preferred_element_type=jnp.float32)
    h = jnp.maximum(h + bstk_ref[0:1, :], 0.0)

    # layer 1 + ReLU
    h = jnp.dot(h.astype(cd), wstk_ref[0], preferred_element_type=jnp.float32)
    h = jnp.maximum(h + bstk_ref[1:2, :], 0.0)

    # layer 2 (no activation)
    h = jnp.dot(h.astype(cd), wstk_ref[1], preferred_element_type=jnp.float32)
    h = h + bstk_ref[2:3, :]

    # fused heads: columns [mean | log_sigma]
    heads = jnp.dot(h.astype(cd), wh_ref[...],
                    preferred_element_type=jnp.float32) + bh_ref[...]
    log_sigma = heads[:, Y_DIM:2 * Y_DIM]

    # use_lvar=False path: sigma = min_std + (1-min_std)*softplus(log_sigma)
    sigma = MIN_STD + (1.0 - MIN_STD) * jnp.logaddexp(log_sigma, 0.0)

    # direct slice stores into the lane-packed output [mean | log_sigma | sigma]
    out_ref[:, 0:2 * Y_DIM] = heads
    out_ref[:, 2 * Y_DIM:3 * Y_DIM] = sigma


def prepare_params(params, compute_dtype=jnp.float32):
    """One-time parameter preparation (fold + stack + cast); cache the result."""
    hi = jax.lax.Precision.HIGHEST
    w0, b0 = params["w0"], params["b0"]
    w0_r = w0[0:HIDDEN_DIM, :]                               # (32, 96)
    w0_z = w0[HIDDEN_DIM:HIDDEN_DIM + LATENT_DIM, :]         # (32, 96)
    w0_x = w0[HIDDEN_DIM + LATENT_DIM:, :]                   # (32, 96)

    # fold target-transform Linear into the x-rows of the first MLP layer
    w0x_fold = jnp.dot(params["wt"], w0_x, precision=hi)     # (3, 96)
    b0f = b0 + jnp.dot(params["bt"], w0_x, precision=hi)     # (1, 96)

    return {
        "w0r": w0_r.astype(compute_dtype),
        "w0z": w0_z.astype(compute_dtype),
        "w0x": w0x_fold.astype(compute_dtype),
        "wstk": jnp.stack([params["w1"], params["w2"]], axis=0).astype(compute_dtype),
        "bstk": jnp.concatenate([b0f, params["b1"], params["b2"]], axis=0).astype(jnp.float32),
        "wh": jnp.concatenate([params["wm"], params["ws"]], axis=1).astype(compute_dtype),
        "bh": jnp.concatenate([params["bm"], params["bs"]], axis=1).astype(jnp.float32),
    }


def decoder_forward(r, z, target_x, prep, *, tm_max=TM_MAX):
    """r: [B,T,hidden], z: [B,T,latent], target_x: [B,T,x_dim].
    prep: output of prepare_params().  Returns (mean, sigma, log_sigma)."""
    B, T, _ = target_x.shape
    M = B * T
    compute_dtype = prep["w0r"].dtype

    tm = _choose_tm(M, tm_max)
    m_pad = _round_up(M, tm)

    r2 = r.reshape(M, HIDDEN_DIM)
    z2 = z.reshape(M, LATENT_DIM)
    x2 = target_x.reshape(M, X_DIM)
    if m_pad != M:
        pad = ((0, m_pad - M), (0, 0))
        r2 = jnp.pad(r2, pad)
        z2 = jnp.pad(z2, pad)
        x2 = jnp.pad(x2, pad)

    def full_spec(a):
        nd = a.ndim
        return pl.BlockSpec(a.shape, lambda i, _nd=nd: (0,) * _nd)

    out = pl.pallas_call(
        functools.partial(_decoder_kernel, compute_dtype=compute_dtype),
        out_shape=jax.ShapeDtypeStruct((m_pad, 3 * Y_DIM), jnp.float32),
        grid_spec=pltpu.PrefetchScalarGridSpec(
            num_scalar_prefetch=0,
            grid=(m_pad // tm,),
            in_specs=[
                pl.BlockSpec((tm, HIDDEN_DIM), lambda i: (i, 0)),   # r
                pl.BlockSpec((tm, LATENT_DIM), lambda i: (i, 0)),   # z
                pl.BlockSpec((tm, X_DIM), lambda i: (i, 0)),        # target_x
                full_spec(prep["w0r"]), full_spec(prep["w0z"]),
                full_spec(prep["w0x"]), full_spec(prep["wstk"]),
                full_spec(prep["bstk"]), full_spec(prep["wh"]),
                full_spec(prep["bh"]),
            ],
            out_specs=pl.BlockSpec((tm, 3 * Y_DIM), lambda i: (i, 0)),
        ),
        compiler_params=pltpu.CompilerParams(
            dimension_semantics=("parallel",)),
    )(r2, z2, x2,
      prep["w0r"], prep["w0z"], prep["w0x"],
      prep["wstk"], prep["bstk"], prep["wh"], prep["bh"])

    out = out[:M]
    mean = out[:, 0:Y_DIM].reshape(B, T, Y_DIM)
    log_sigma = out[:, Y_DIM:2 * Y_DIM].reshape(B, T, Y_DIM)
    sigma = out[:, 2 * Y_DIM:3 * Y_DIM].reshape(B, T, Y_DIM)
    return mean, sigma, log_sigma


def init_params(key):
    """Deterministic init; Linear weights stored (in, out), biases (1, out)."""
    def linear(k, fan_in, fan_out):
        kw, kb = jax.random.split(k)
        bound = 1.0 / math.sqrt(fan_in)
        w = jax.random.uniform(kw, (fan_in, fan_out), jnp.float32, -bound, bound)
        b = jax.random.uniform(kb, (1, fan_out), jnp.float32, -bound, bound)
        return w, b

    keys = jax.random.split(key, 6)
    p = {}
    p["wt"], p["bt"] = linear(keys[0], X_DIM, HIDDEN_DIM)           # target transform
    p["w0"], p["b0"] = linear(keys[1], HIDDEN_DIM_2, HIDDEN_DIM_2)  # BatchMLP initial
    p["w1"], p["b1"] = linear(keys[2], HIDDEN_DIM_2, HIDDEN_DIM_2)  # BatchMLP hidden
    p["w2"], p["b2"] = linear(keys[3], HIDDEN_DIM_2, HIDDEN_DIM_2)  # BatchMLP final
    p["wm"], p["bm"] = linear(keys[4], HIDDEN_DIM_2, Y_DIM)         # mean head
    p["ws"], p["bs"] = linear(keys[5], HIDDEN_DIM_2, Y_DIM)         # std head
    return p


def reference_forward(r, z, target_x, params):
    """Plain-JAX reference with the ORIGINAL (unfused) parameterization."""
    hi = jax.lax.Precision.HIGHEST
    x = jnp.dot(target_x, params["wt"], precision=hi) + params["bt"]
    h = jnp.concatenate([r, z, x], axis=-1)
    h = jnp.maximum(jnp.dot(h, params["w0"], precision=hi) + params["b0"], 0.0)
    h = jnp.maximum(jnp.dot(h, params["w1"], precision=hi) + params["b1"], 0.0)
    h = jnp.dot(h, params["w2"], precision=hi) + params["b2"]
    mean = jnp.dot(h, params["wm"], precision=hi) + params["bm"]
    log_sigma = jnp.dot(h, params["ws"], precision=hi) + params["bs"]
    sigma = MIN_STD + (1.0 - MIN_STD) * jax.nn.softplus(log_sigma)
    return mean, sigma, log_sigma


if __name__ == "__main__":
    key = jax.random.PRNGKey(0)
    kp, kr, kz, kx = jax.random.split(key, 4)

    B, T = 2, 8
    params = init_params(kp)
    prep = prepare_params(params)            # one-time prep, out of the hot path
    r = jax.random.normal(kr, (B, T, HIDDEN_DIM), jnp.float32)
    z = jax.random.normal(kz, (B, T, LATENT_DIM), jnp.float32)
    target_x = jax.random.normal(kx, (B, T, X_DIM), jnp.float32)

    mean, sigma, log_sigma = decoder_forward(r, z, target_x, prep)
    jax.block_until_ready((mean, sigma, log_sigma))

    # correctness check against plain-JAX reference (unfused parameterization);
    # the algebraic fold differs only by fp rounding.
    rm, rs, rl = reference_forward(r, z, target_x, params)
    assert jnp.allclose(mean, rm, atol=5e-5, rtol=5e-5)
    assert jnp.allclose(sigma, rs, atol=5e-5, rtol=5e-5)
    assert jnp.allclose(log_sigma, rl, atol=5e-5, rtol=5e-5)

    # TODO(synk): torch.distributions.Normal(mean, sigma) object has no Pallas
    # equivalent; the kernel returns (mean, sigma, log_sigma) instead.
    print("KERNEL_OK")
</pallas_src>

<mosaic_0001>
module attributes {stable_mosaic.version = 11 : i64} {
  func.func @_decoder_kernel(%arg0: i32, %arg1: memref<128x32xf32, #tpu.memory_space<vmem>>, %arg2: memref<128x32xf32, #tpu.memory_space<vmem>>, %arg3: memref<128x3xf32, #tpu.memory_space<vmem>>, %arg4: memref<32x96xf32, #tpu.memory_space<vmem>>, %arg5: memref<32x96xf32, #tpu.memory_space<vmem>>, %arg6: memref<3x96xf32, #tpu.memory_space<vmem>>, %arg7: memref<2x96x96xf32, #tpu.memory_space<vmem>>, %arg8: memref<3x96xf32, #tpu.memory_space<vmem>>, %arg9: memref<96x4xf32, #tpu.memory_space<vmem>>, %arg10: memref<1x4xf32, #tpu.memory_space<vmem>>, %arg11: memref<128x6xf32, #tpu.memory_space<vmem>>) attributes {dimension_semantics = [#tpu.dimension_semantics<parallel>], iteration_bounds = array<i64: 1>, scalar_prefetch = 0 : i64, scratch_operands = 0 : i64, tpu.core_type = #tpu.core_type<tc>, window_params = [{transform_indices = @transform_0, window_bounds = array<i64: 128, 32>}, {transform_indices = @transform_1, window_bounds = array<i64: 128, 32>}, {transform_indices = @transform_2, window_bounds = array<i64: 128, 3>}, {pipeline_mode = #tpu.pipeline_mode<synchronous>, transform_indices = @transform_3, window_bounds = array<i64: 32, 96>}, {pipeline_mode = #tpu.pipeline_mode<synchronous>, transform_indices = @transform_4, window_bounds = array<i64: 32, 96>}, {pipeline_mode = #tpu.pipeline_mode<synchronous>, transform_indices = @transform_5, window_bounds = array<i64: 3, 96>}, {pipeline_mode = #tpu.pipeline_mode<synchronous>, transform_indices = @transform_6, window_bounds = array<i64: 2, 96, 96>}, {pipeline_mode = #tpu.pipeline_mode<synchronous>, transform_indices = @transform_7, window_bounds = array<i64: 3, 96>}, {pipeline_mode = #tpu.pipeline_mode<synchronous>, transform_indices = @transform_8, window_bounds = array<i64: 96, 4>}, {pipeline_mode = #tpu.pipeline_mode<synchronous>, transform_indices = @transform_9, window_bounds = array<i64: 1, 4>}, {transform_indices = @transform_10, window_bounds = array<i64: 128, 6>}]} {
    %c0 = arith.constant 0 : index
    %c0_0 = arith.constant 0 : index
    %0 = vector.load %arg1[%c0, %c0_0] : memref<128x32xf32, #tpu.memory_space<vmem>>, vector<128x32xf32>
    %c0_1 = arith.constant 0 : index
    %c0_2 = arith.constant 0 : index
    %1 = vector.load %arg4[%c0_1, %c0_2] : memref<32x96xf32, #tpu.memory_space<vmem>>, vector<32x96xf32>
    %cst = arith.constant dense<0.000000e+00> : vector<128x96xf32>
    %2 = tpu.matmul %0, %1, %cst {dimension_numbers = #tpu.dot_dimension_numbers<[1], [0], [0], [1], [0, 0, 1, 1], [], []>} : vector<128x32xf32>, vector<32x96xf32>, vector<128x96xf32> -> vector<128x96xf32>
    %c0_3 = arith.constant 0 : index
    %c0_4 = arith.constant 0 : index
    %3 = vector.load %arg2[%c0_3, %c0_4] : memref<128x32xf32, #tpu.memory_space<vmem>>, vector<128x32xf32>
    %c0_5 = arith.constant 0 : index
    %c0_6 = arith.constant 0 : index
    %4 = vector.load %arg5[%c0_5, %c0_6] : memref<32x96xf32, #tpu.memory_space<vmem>>, vector<32x96xf32>
    %cst_7 = arith.constant dense<0.000000e+00> : vector<128x96xf32>
    %5 = tpu.matmul %3, %4, %cst_7 {dimension_numbers = #tpu.dot_dimension_numbers<[1], [0], [0], [1], [0, 0, 1, 1], [], []>} : vector<128x32xf32>, vector<32x96xf32>, vector<128x96xf32> -> vector<128x96xf32>
    %6 = arith.addf %2, %5 : vector<128x96xf32>
    %c0_8 = arith.constant 0 : index
    %c0_9 = arith.constant 0 : index
    %7 = vector.load %arg3[%c0_8, %c0_9] : memref<128x3xf32, #tpu.memory_space<vmem>>, vector<128x3xf32>
    %c0_10 = arith.constant 0 : index
    %c0_11 = arith.constant 0 : index
    %8 = vector.load %arg6[%c0_10, %c0_11] : memref<3x96xf32, #tpu.memory_space<vmem>>, vector<3x96xf32>
    %cst_12 = arith.constant dense<0.000000e+00> : vector<128x96xf32>
    %9 = tpu.matmul %7, %8, %cst_12 {dimension_numbers = #tpu.dot_dimension_numbers<[1], [0], [0], [1], [0, 0, 1, 1], [], []>} : vector<128x3xf32>, vector<3x96xf32>, vector<128x96xf32> -> vector<128x96xf32>
    %10 = arith.addf %6, %9 : vector<128x96xf32>
    %c0_13 = arith.constant 0 : index
    %c0_14 = arith.constant 0 : index
    %11 = vector.load %arg8[%c0_13, %c0_14] : memref<3x96xf32, #tpu.memory_space<vmem>>, vector<1x96xf32>
    %12 = vector.broadcast %11 : vector<1x96xf32> to vector<128x96xf32>
    %13 = arith.addf %10, %12 : vector<128x96xf32>
    %cst_15 = arith.constant 0.000000e+00 : f32
    %14 = vector.broadcast %cst_15 : f32 to vector<128x96xf32>
    %15 = arith.maximumf %13, %14 : vector<128x96xf32>
    %c0_16 = arith.constant 0 : index
    %c0_17 = arith.constant 0 : index
    %c0_18 = arith.constant 0 : index
    %16 = vector.load %arg7[%c0_16, %c0_17, %c0_18] : memref<2x96x96xf32, #tpu.memory_space<vmem>>, vector<1x96x96xf32>
    %17 = vector.shape_cast %16 : vector<1x96x96xf32> to vector<96x96xf32>
    %cst_19 = arith.constant dense<0.000000e+00> : vector<128x96xf32>
    %18 = tpu.matmul %15, %17, %cst_19 {dimension_numbers = #tpu.dot_dimension_numbers<[1], [0], [0], [1], [0, 0, 1, 1], [], []>} : vector<128x96xf32>, vector<96x96xf32>, vector<128x96xf32> -> vector<128x96xf32>
    %c1 = arith.constant 1 : index
    %c0_20 = arith.constant 0 : index
    %19 = vector.load %arg8[%c1, %c0_20] : memref<3x96xf32, #tpu.memory_space<vmem>>, vector<1x96xf32>
    %20 = vector.broadcast %19 : vector<1x96xf32> to vector<128x96xf32>
    %21 = arith.addf %18, %20 : vector<128x96xf32>
    %cst_21 = arith.constant 0.000000e+00 : f32
    %22 = vector.broadcast %cst_21 : f32 to vector<128x96xf32>
    %23 = arith.maximumf %21, %22 : vector<128x96xf32>
    %c1_22 = arith.constant 1 : index
    %c0_23 = arith.constant 0 : index
    %c0_24 = arith.constant 0 : index
    %24 = vector.load %arg7[%c1_22, %c0_23, %c0_24] : memref<2x96x96xf32, #tpu.memory_space<vmem>>, vector<1x96x96xf32>
    %25 = vector.shape_cast %24 : vector<1x96x96xf32> to vector<96x96xf32>
    %cst_25 = arith.constant dense<0.000000e+00> : vector<128x96xf32>
    %26 = tpu.matmul %23, %25, %cst_25 {dimension_numbers = #tpu.dot_dimension_numbers<[1], [0], [0], [1], [0, 0, 1, 1], [], []>} : vector<128x96xf32>, vector<96x96xf32>, vector<128x96xf32> -> vector<128x96xf32>
    %c2 = arith.constant 2 : index
    %c0_26 = arith.constant 0 : index
    %27 = vector.load %arg8[%c2, %c0_26] : memref<3x96xf32, #tpu.memory_space<vmem>>, vector<1x96xf32>
    %28 = vector.broadcast %27 : vector<1x96xf32> to vector<128x96xf32>
    %29 = arith.addf %26, %28 : vector<128x96xf32>
    %c0_27 = arith.constant 0 : index
    %c0_28 = arith.constant 0 : index
    %30 = vector.load %arg9[%c0_27, %c0_28] : memref<96x4xf32, #tpu.memory_space<vmem>>, vector<96x4xf32>
    %cst_29 = arith.constant dense<0.000000e+00> : vector<128x4xf32>
    %31 = tpu.matmul %29, %30, %cst_29 {dimension_numbers = #tpu.dot_dimension_numbers<[1], [0], [0], [1], [0, 0, 1, 1], [], []>} : vector<128x96xf32>, vector<96x4xf32>, vector<128x4xf32> -> vector<128x4xf32>
    %c0_30 = arith.constant 0 : index
    %c0_31 = arith.constant 0 : index
    %32 = vector.load %arg10[%c0_30, %c0_31] : memref<1x4xf32, #tpu.memory_space<vmem>>, vector<1x4xf32>
    %33 = vector.broadcast %32 : vector<1x4xf32> to vector<128x4xf32>
    %34 = arith.addf %31, %33 : vector<128x4xf32>
    %35 = vector.extract_strided_slice %34 {offsets = [0, 2], sizes = [128, 2], strides = [1, 1]} : vector<128x4xf32> to vector<128x2xf32>
    %cst_32 = arith.constant 0.000000e+00 : f32
    %36 = vector.broadcast %cst_32 : f32 to vector<128x2xf32>
    %37 = arith.maximumf %35, %36 : vector<128x2xf32>
    %38 = vector.broadcast %cst_32 : f32 to vector<128x2xf32>
    %39 = arith.subf %35, %38 : vector<128x2xf32>
    %40 = arith.cmpf one, %39, %39 : vector<128x2xf32>
    %41 = vector.broadcast %cst_32 : f32 to vector<128x2xf32>
    %42 = arith.addf %35, %41 : vector<128x2xf32>
    %43 = math.absf %39 : vector<128x2xf32>
    %cst_33 = arith.constant 0.000000e+00 : f32
    %44 = vector.broadcast %cst_33 : f32 to vector<128x2xf32>
    %45 = arith.subf %44, %43 : vector<128x2xf32>
    %46 = math.exp %45 : vector<128x2xf32>
    %47 = math.log1p %46 : vector<128x2xf32>
    %48 = arith.addf %37, %47 : vector<128x2xf32>
    %49 = arith.select %40, %42, %48 : vector<128x2xi1>, vector<128x2xf32>
    %cst_34 = arith.constant 9.900000e-01 : f32
    %50 = vector.broadcast %cst_34 : f32 to vector<128x2xf32>
    %51 = arith.mulf %50, %49 : vector<128x2xf32>
    %cst_35 = arith.constant 0.00999999977 : f32
    %52 = vector.broadcast %cst_35 : f32 to vector<128x2xf32>
    %53 = arith.addf %52, %51 : vector<128x2xf32>
    %c0_36 = arith.constant 0 : index
    %c0_37 = arith.constant 0 : index
    %54 = vector.load %arg11[%c0_36, %c0_37] : memref<128x6xf32, #tpu.memory_space<vmem>>, vector<128x4xf32>
    tpu.vector_store %arg11[%c0_36, %c0_37], %34 {strides = array<i32>} : memref<128x6xf32, #tpu.memory_space<vmem>>, vector<128x4xf32>,
    %c0_38 = arith.constant 0 : index
    %c4 = arith.constant 4 : index
    %55 = vector.load %arg11[%c0_38, %c4] : memref<128x6xf32, #tpu.memory_space<vmem>>, vector<128x2xf32>
    tpu.vector_store %arg11[%c0_38, %c4], %53 {strides = array<i32>} : memref<128x6xf32, #tpu.memory_space<vmem>>, vector<128x2xf32>,
    return
  }
  func.func @transform_0(%arg0: i32) -> (i32, i32) {
    %c0_i32 = arith.constant 0 : i32
    %c0_i32_0 = arith.constant 0 : i32
    return %arg0, %c0_i32 : i32, i32
  }
  func.func @transform_1(%arg0: i32) -> (i32, i32) {
    %c0_i32 = arith.constant 0 : i32
    %c0_i32_0 = arith.constant 0 : i32
    return %arg0, %c0_i32 : i32, i32
  }
  func.func @transform_2(%arg0: i32) -> (i32, i32) {
    %c0_i32 = arith.constant 0 : i32
    %c0_i32_0 = arith.constant 0 : i32
    return %arg0, %c0_i32 : i32, i32
  }
  func.func @transform_3(%arg0: i32) -> (i32, i32) {
    %c0_i32 = arith.constant 0 : i32
    %c0_i32_0 = arith.constant 0 : i32
    %c0_i32_1 = arith.constant 0 : i32
    return %c0_i32, %c0_i32_0 : i32, i32
  }
  func.func @transform_4(%arg0: i32) -> (i32, i32) {
    %c0_i32 = arith.constant 0 : i32
    %c0_i32_0 = arith.constant 0 : i32
    %c0_i32_1 = arith.constant 0 : i32
    return %c0_i32, %c0_i32_0 : i32, i32
  }
  func.func @transform_5(%arg0: i32) -> (i32, i32) {
    %c0_i32 = arith.constant 0 : i32
    %c0_i32_0 = arith.constant 0 : i32
    %c0_i32_1 = arith.constant 0 : i32
    return %c0_i32, %c0_i32_0 : i32, i32
  }
  func.func @transform_6(%arg0: i32) -> (i32, i32, i32) {
    %c0_i32 = arith.constant 0 : i32
    %c0_i32_0 = arith.constant 0 : i32
    %c0_i32_1 = arith.constant 0 : i32
    %c0_i32_2 = arith.constant 0 : i32
    return %c0_i32, %c0_i32_0, %c0_i32_1 : i32, i32, i32
  }
  func.func @transform_7(%arg0: i32) -> (i32, i32) {
    %c0_i32 = arith.constant 0 : i32
    %c0_i32_0 = arith.constant 0 : i32
    %c0_i32_1 = arith.constant 0 : i32
    return %c0_i32, %c0_i32_0 : i32, i32
  }
  func.func @transform_8(%arg0: i32) -> (i32, i32) {
    %c0_i32 = arith.constant 0 : i32
    %c0_i32_0 = arith.constant 0 : i32
    %c0_i32_1 = arith.constant 0 : i32
    return %c0_i32, %c0_i32_0 : i32, i32
  }
  func.func @transform_9(%arg0: i32) -> (i32, i32) {
    %c0_i32 = arith.constant 0 : i32
    %c0_i32_0 = arith.constant 0 : i32
    %c0_i32_1 = arith.constant 0 : i32
    return %c0_i32, %c0_i32_0 : i32, i32
  }
  func.func @transform_10(%arg0: i32) -> (i32, i32) {
    %c0_i32 = arith.constant 0 : i32
    %c0_i32_0 = arith.constant 0 : i32
    return %arg0, %c0_i32 : i32, i32
  }
}

</mosaic_0001>

<bundles_post_ra>
// kernel: tpu_custom_call.1
= control target key start
LH: loop header
LB: loop body
LE: loop exit
PB: predicated region body
PF: predicated region fallthrough
CT: control target
= control target key end

     0   :  { %vm75_vm0 = vcmask 261120   ;;  %vm528_vm1 = vcmask 1042432   ;;  %vm479_vm2 = vcmask 23552   ;;  %vm747_vm3 = vcmask 785408   ;;  %s3450_s4 = inlined_call_operand.vmem [shape: f32[32,96], index: 4, kind: input, shape index: {}]   ;;  %s3451_s1 = inlined_call_operand.vmem [shape: f32[128,32], index: 1, kind: input, shape index: {}]   ;;  %s3452_s3 = inlined_call_operand.vmem [shape: f32[32,96], index: 3, kind: input, shape index: {}]   ;;  %s3453_s5 = inlined_call_operand.vmem [shape: f32[3,96], index: 5, kind: input, shape index: {}]   ;;  %s3454_s6 = inlined_call_operand.vmem [shape: f32[2,96,96], index: 6, kind: input, shape index: {}]   ;;  %s3455_s0 = inlined_call_operand.vmem [shape: f32[128,32], index: 0, kind: input, shape index: {}]   ;;  %s3456_s2 = inlined_call_operand.vmem [shape: f32[128,3], index: 2, kind: input, shape index: {}]   ;;  %s3457_s7 = inlined_call_operand.vmem [shape: f32[3,96], index: 7, kind: input, shape index: {}]   ;;  %s3458_s8 = inlined_call_operand.vmem [shape: f32[96,4], index: 8, kind: input, shape index: {}]   ;;  %s3459_s9 = inlined_call_operand.vmem [shape: f32[1,4], index: 9, kind: input, shape index: {}]   ;;  %s3460_s10 = inlined_call_operand.vmem [shape: f32[128,6], index: 10, kind: output, shape index: {}]  }
   0x1   :  { %v71_v0 = vld [vmem:[%s3450_s4] sm:$0xff]  ;;  %v72_v1 = vld [vmem:[%s3450_s4 + $0x8] sm:$0xff]  ;;  %v73_v2 = vld [vmem:[%s3450_s4 + $0x10] sm:$0xff]  ;;  %vm1700_vm4 = vcmask 31744  }
   0x2   :  { %v2290_v3 = vpack.c.bf16 %v72_v1, %v71_v0  ;;  %v74_v4 = vld [vmem:[%s3450_s4 + $0x18] sm:$0xff]  ;;  %v55_v5 = vld [vmem:[%s3451_s1] sm:$0xff]  ;;  %v52_v8 = vld [vmem:[%s3452_s3 + $0x8] sm:$0xff] }
   0x3   :  { %v2294_v6 = vpack.c.bf16 %v74_v4, %v73_v2  ;;  %2064 = vmatprep.mubr.msk.f32.mxu0 %vm75_vm0, %v55_v5  ;;  %v51_v7 = vld [vmem:[%s3452_s3] sm:$0xff]  ;;  %v53_v10 = vld [vmem:[%s3452_s3 + $0x10] sm:$0xff]  ;;  %v54_v11 = vld [vmem:[%s3452_s3 + $0x18] sm:$0xff] }
   0x4   :  { %2291 = vmatprep.subr.bf16.mxu0 %v2290_v3  ;;  %v2298_v9 = vpack.c.bf16 %v52_v8, %v51_v7  ;;  %v56_v12 = vld [vmem:[%s3451_s1 + $0x8] sm:$0xff]  ;;  %v57_v13 = vld [vmem:[%s3451_s1 + $0x10] sm:$0xff]  ;;  %v2302_v14 = vpack.c.bf16 %v54_v11, %v53_v10  ;;  %v58_v15 = vld [vmem:[%s3451_s1 + $0x18] sm:$0xff] }
   0x5   :  { %2293 = vmatpush3.bf16.msra.mxu0 %v2290_v3  ;;  %v59_v16 = vld [vmem:[%s3451_s1 + $0x20] sm:$0xff]  ;;  %v60_v18 = vld [vmem:[%s3451_s1 + $0x28] sm:$0xff]  ;;  %v61_v19 = vld [vmem:[%s3451_s1 + $0x30] sm:$0xff] }
   0x6   :  { %2295 = vmatprep.subr.bf16.mxu0 %v2294_v6  ;;  %v478_v17 = vld [vmem:[%s3453_s5] sm:$0x7]  ;;  %v731_v21 = vld [vmem:[%s3454_s6 + $0x8] sm:$0xff]  ;;  %v732_v22 = vld [vmem:[%s3454_s6 + $0x10] sm:$0xff] }
   0x7   :  { %v730_v20 = vld [vmem:[%s3454_s6] sm:$0xff]  ;;  %v62_v23 = vld [vmem:[%s3451_s1 + $0x38] sm:$0xff]  ;;  %v735_v29 = vld [vmem:[%s3454_s6 + $0x28] sm:$0xff] }
   0x8   :  { %v2611_v24 = vpack.c.bf16 %v731_v21, %v730_v20  ;;  %v733_v25 = vld [vmem:[%s3454_s6 + $0x18] sm:$0xff]  ;;  %v63_v26 = vld [vmem:[%s3451_s1 + $0x40] sm:$0xff]  ;;  %v64_v30 = vld [vmem:[%s3451_s1 + $0x48] sm:$0xff] }
   0x9   :  { %2297 = vmatpush3.bf16.msra.mxu0 %v2294_v6  ;;  %v2619_v27 = vpack.c.bf16 %v733_v25, %v732_v22  ;;  %v734_v28 = vld [vmem:[%s3454_s6 + $0x20] sm:$0xff]  ;;  %v65_v31 = vld [vmem:[%s3451_s1 + $0x50] sm:$0xff]  ;;  %v737_v34 = vld [vmem:[%s3454_s6 + $0x38] sm:$0xff] }
   0xa   :  { %2299 = vmatprep.subr.bf16.mxu0 %v2298_v9  ;;  %2378 = vmatprep.subr.bf16.mxu1 %v2611_v24  ;;  %v2638_v32 = vpack.c.bf16 %v735_v29, %v734_v28  ;;  %v736_v33 = vld [vmem:[%s3454_s6 + $0x30] sm:$0xff]  ;;  %v66_v35 = vld [vmem:[%s3451_s1 + $0x58] sm:$0xff]  ;;  %v67_v36 = vld [vmem:[%s3451_s1 + $0x60] sm:$0xff] }
   0xb   :  { %2384 = vmatpush3.bf16.msra.mxu1 %v2611_v24  ;;  %v2656_v37 = vpack.c.bf16 %v737_v34, %v736_v33  ;;  %v738_v38 = vld [vmem:[%s3454_s6 + $0x40] sm:$0xff]  ;;  %v739_v39 = vld [vmem:[%s3454_s6 + $0x48] sm:$0xff]  ;;  %v69_v41 = vld [vmem:[%s3451_s1 + $0x70] sm:$0xff] }
   0xc   :  { %2065 = vmatmul.mubr.msk.f32.vlgmr.msra.gmra.mrb[0].mxu0 %vm75_vm0, %v56_v12  ;;  %2379 = vmatprep.subr.bf16.mxu1 %v2619_v27  ;;  %v68_v40 = vld [vmem:[%s3451_s1 + $0x68] sm:$0xff]  ;;  %v2674_v42 = vpack.c.bf16 %v739_v39, %v738_v38  ;;  %v70_v43 = vld [vmem:[%s3451_s1 + $0x78] sm:$0xff]  ;;  %v35_v44 = vld [vmem:[%s3455_s0] sm:$0xff] }
   0xd   :  { %2301 = vmatpush3.bf16.msra.mxu0 %v2298_v9  ;;  %2067 = vmatprep.mubr.msk.f32.mxu0 %vm75_vm0, %v57_v13  ;;  %v36_v45 = vld [vmem:[%s3455_s0 + $0x8] sm:$0xff]  ;;  %v37_v46 = vld [vmem:[%s3455_s0 + $0x10] sm:$0xff]  ;;  %v38_v47 = vld [vmem:[%s3455_s0 + $0x18] sm:$0xff] }
   0xe   :  { %2303 = vmatprep.subr.bf16.mxu0 %v2302_v14  ;;  %v39_v48 = vld [vmem:[%s3455_s0 + $0x20] sm:$0xff]  ;;  %v40_v49 = vld [vmem:[%s3455_s0 + $0x28] sm:$0xff]  ;;  %v41_v50 = vld [vmem:[%s3455_s0 + $0x30] sm:$0xff] }
   0xf   :  { %2385 = vmatpush3.bf16.msra.mxu1 %v2619_v27  ;;  %v42_v51 = vld [vmem:[%s3455_s0 + $0x38] sm:$0xff]  ;;  %v43_v52 = vld [vmem:[%s3455_s0 + $0x40] sm:$0xff]  ;;  %v44_v53 = vld [vmem:[%s3455_s0 + $0x48] sm:$0xff] }
  0x10   :  { %2068 = vmatmul.mubr.msk.f32.gmra.mrb[2].mxu0 %vm75_vm0, %v58_v15  ;;  %2380 = vmatprep.subr.bf16.mxu1 %v2638_v32  ;;  %v45_v54 = vld [vmem:[%s3455_s0 + $0x50] sm:$0xff]  ;;  %v46_v55 = vld [vmem:[%s3455_s0 + $0x58] sm:$0xff]  ;;  %v47_v56 = vld [vmem:[%s3455_s0 + $0x60] sm:$0xff] }
  0x11   :  { %2070 = vmatprep.mubr.msk.f32.mxu0 %vm75_vm0, %v59_v16  ;;  %2305 = vmatpush3.bf16.msra.mxu0 %v2302_v14  ;;  %v48_v57 = vld [vmem:[%s3455_s0 + $0x68] sm:$0xff]  ;;  %v49_v58 = vld [vmem:[%s3455_s0 + $0x70] sm:$0xff]  ;;  %v50_v59 = vld [vmem:[%s3455_s0 + $0x78] sm:$0xff] }
  0x12   :  { %2120 = vmatprep.subr.msk.mxu0 %vm528_vm1, %v478_v17  ;;  %v462_v60 = vld [vmem:[%s3456_s2] sm:$0xff]  ;;  %v463_v61 = vld [vmem:[%s3456_s2 + $0x8] sm:$0xff]  ;;  %v464_v62 = vld [vmem:[%s3456_s2 + $0x10] sm:$0xff] }
  0x13   :  { %2386 = vmatpush3.bf16.msra.mxu1 %v2638_v32  ;;  %v465_v63 = vld [vmem:[%s3456_s2 + $0x18] sm:$0xff]  ;;  %v466_v0 = vld [vmem:[%s3456_s2 + $0x20] sm:$0xff]  ;;  %v467_v1 = vld [vmem:[%s3456_s2 + $0x28] sm:$0xff] }
  0x14   :  { %2071 = vmatmul.mubr.msk.f32.gmra.mrb[4].mxu0 %vm75_vm0, %v60_v18  ;;  %2381 = vmatprep.subr.bf16.mxu1 %v2656_v37  ;;  %v468_v2 = vld [vmem:[%s3456_s2 + $0x30] sm:$0xff]  ;;  %v469_v3 = vld [vmem:[%s3456_s2 + $0x38] sm:$0xff]  ;;  %v470_v4 = vld [vmem:[%s3456_s2 + $0x40] sm:$0xff] }
  0x15   :  { %2073 = vmatprep.mubr.msk.f32.mxu0 %vm75_vm0, %v61_v19  ;;  %v471_v5 = vld [vmem:[%s3456_s2 + $0x48] sm:$0xff]  ;;  %v472_v6 = vld [vmem:[%s3456_s2 + $0x50] sm:$0xff]  ;;  %v473_v7 = vld [vmem:[%s3456_s2 + $0x58] sm:$0xff] }
  0x16   :  { %v474_v8 = vld [vmem:[%s3456_s2 + $0x60] sm:$0xff]  ;;  %v475_v9 = vld [vmem:[%s3456_s2 + $0x68] sm:$0xff]  ;;  %v476_v10 = vld [vmem:[%s3456_s2 + $0x70] sm:$0xff] }
  0x17   :  { %2387 = vmatpush3.bf16.msra.mxu1 %v2656_v37  ;;  %v477_v11 = vld [vmem:[%s3456_s2 + $0x78] sm:$0xff]  ;;  %v740_v12 = vld [vmem:[%s3454_s6 + $0x50] sm:$0xff]  ;;  %v1869_v15 = vld [vmem:[%s3454_s6 + $0x60] sm:$0xff] }
  0x18   :  { %2074 = vmatmul.mubr.msk.f32.gmra.mrb[6].mxu0 %vm75_vm0, %v62_v23  ;;  %2382 = vmatprep.subr.bf16.mxu1 %v2674_v42  ;;  %v741_v13 = vld [vmem:[%s3454_s6 + $0x58] sm:$0xff]  ;;  %v1870_v16 = vld [vmem:[%s3454_s6 + $0x68] sm:$0xff]  ;;  %v2839_v18 = vld [vmem:[%s3457_s7] ss:$0 sm:$0xff] }
  0x19   :  { %2076 = vmatprep.mubr.msk.f32.mxu0 %vm75_vm0, %v63_v26  ;;  %v2326_v14 = vpack.c.bf16 %v741_v13, %v740_v12 }
  0x1b   :  { %2388 = vmatpush3.bf16.msra.mxu1 %v2674_v42 }
  0x1c   :  { %2077 = vmatmul.mubr.msk.f32.gmra.mrb[8].mxu0 %vm75_vm0, %v64_v30  ;;  %2383 = vmatprep.subr.bf16.mxu1 %v2326_v14 }
  0x1d   :  { %2079 = vmatprep.mubr.msk.f32.mxu0 %vm75_vm0, %v65_v31 }
  0x1f   :  { %2389 = vmatpush3.bf16.msra.mxu1 %v2326_v14 }
  0x20   :  { %2080 = vmatmul.mubr.msk.f32.gmra.mrb[10].mxu0 %vm75_vm0, %v66_v35  ;;  %v1871_v35 = vld [vmem:[%s3454_s6 + $0x70] sm:$0xff] }
  0x21   :  { %2082 = vmatprep.mubr.msk.f32.mxu0 %vm75_vm0, %v67_v36  ;;  %v1872_v36 = vld [vmem:[%s3454_s6 + $0x78] sm:$0xff] }
  0x24   :  { %2083 = vmatmul.mubr.msk.f32.gmra.mrb[12].mxu0 %vm75_vm0, %v68_v40 }
  0x25   :  { %2085 = vmatprep.mubr.msk.f32.mxu0 %vm75_vm0, %v69_v41 }
  0x28   :  { %2086 = vmatmul.mubr.msk.f32.gmra.mrb[14].mxu0 %vm75_vm0, %v70_v43 }
  0x29   :  { %2096 = vmatprep.mubr.msk.f32.mxu0 %vm75_vm0, %v35_v44  ;;  %v1873_v44 = vld [vmem:[%s3454_s6 + $0x80] sm:$0xff] }
  0x2c   :  { %2097 = vmatmul.mubr.msk.f32.vlgmr.msra.gmra.mrb[0].mxu0 %vm75_vm0, %v36_v45  ;;  %v1874_v45 = vld [vmem:[%s3454_s6 + $0x88] sm:$0xff] }
  0x2d   :  { %2121 = vmatpush3.msk.msra.mxu0 %vm528_vm1, %v478_v17  ;;  %2099 = vmatprep.mubr.msk.f32.mxu0 %vm75_vm0, %v37_v46  ;;  %v2330_v17 = vpack.c.bf16 %v1870_v16, %v1869_v15  ;;  %v1879_v15 = vld [vmem:[%s3454_s6 + $0xb0] sm:$0xff]  ;;  %v1880_v16 = vld [vmem:[%s3454_s6 + $0xb8] sm:$0xff] }
  0x2e   :  { %2307 = vmatprep.subr.bf16.mxu0 %v2611_v24 }
  0x2f   :  { %2331 = vmatprep.subr.bf16.mxu1 %v2330_v17 }
  0x30   :  { %2100 = vmatmul.mubr.msk.f32.gmra.mrb[2].mxu0 %vm75_vm0, %v38_v47 }
  0x31   :  { %2102 = vmatprep.mubr.msk.f32.mxu0 %vm75_vm0, %v39_v48 }
  0x34   :  { %2103 = vmatmul.mubr.msk.f32.gmra.mrb[4].mxu0 %vm75_vm0, %v40_v49 }
  0x35   :  { %2105 = vmatprep.mubr.msk.f32.mxu0 %vm75_vm0, %v41_v50 }
  0x38   :  { %2106 = vmatmul.mubr.msk.f32.gmra.mrb[6].mxu0 %vm75_vm0, %v42_v51  ;;  %v2338_v51 = vpack.c.bf16 %v1874_v45, %v1873_v44  ;;  %v1174_v44 = vld [vmem:[%s3458_s8 + $0x30] sm:$0xff]  ;;  %v1175_v45 = vld [vmem:[%s3458_s8 + $0x38] sm:$0xff] }
  0x39   :  { %2108 = vmatprep.mubr.msk.f32.mxu0 %vm75_vm0, %v43_v52 }
  0x3c   :  { %2109 = vmatmul.mubr.msk.f32.gmra.mrb[8].mxu0 %vm75_vm0, %v44_v53  ;;  %v1875_v53 = vld [vmem:[%s3454_s6 + $0x90] sm:$0xff] }
  0x3d   :  { %2111 = vmatprep.mubr.msk.f32.mxu0 %vm75_vm0, %v45_v54  ;;  %v1876_v54 = vld [vmem:[%s3454_s6 + $0x98] sm:$0xff] }
  0x40   :  { %2112 = vmatmul.mubr.msk.f32.gmra.mrb[10].mxu0 %vm75_vm0, %v46_v55 }
  0x41   :  { %2114 = vmatprep.mubr.msk.f32.mxu0 %vm75_vm0, %v47_v56 }
  0x44   :  { %2115 = vmatmul.mubr.msk.f32.gmra.mrb[12].mxu0 %vm75_vm0, %v48_v57 }
  0x45   :  { %2117 = vmatprep.mubr.msk.f32.mxu0 %vm75_vm0, %v49_v58 }
  0x48   :  { %2118 = vmatmul.mubr.msk.f32.gmra.mrb[14].mxu0 %vm75_vm0, %v50_v59 }
  0x49   :  { %2122 = vmatprep.mubr.msk.f32.mxu0 %vm479_vm2, %v462_v60  ;;  %v2342_v60 = vpack.c.bf16 %v1876_v54, %v1875_v53  ;;  %v1176_v53 = vld [vmem:[%s3458_s8 + $0x40] sm:$0xff]  ;;  %v1177_v54 = vld [vmem:[%s3458_s8 + $0x48] sm:$0xff] }
  0x4c   :  { %2123 = vmatmul.mubr.msk.f32.vlgmr.msra.gmra.mrb[0].mxu0 %vm479_vm2, %v463_v61 }
  0x4d   :  { %2125 = vmatprep.mubr.msk.f32.mxu0 %vm479_vm2, %v464_v62  ;;  %2309 = vmatpush3.bf16.msra.mxu0 %v2611_v24  ;;  %v1877_v62 = vld [vmem:[%s3454_s6 + $0xa0] sm:$0xff] }
  0x4e   :  { %2311 = vmatprep.subr.bf16.mxu0 %v2619_v27 }
  0x50   :  { %2126 = vmatmul.mubr.msk.f32.gmra.mrb[2].mxu0 %vm479_vm2, %v465_v63  ;;  %v1878_v63 = vld [vmem:[%s3454_s6 + $0xa8] sm:$0xff] }
  0x51   :  { %2128 = vmatprep.mubr.msk.f32.mxu0 %vm479_vm2, %v466_v0  ;;  %2313 = vmatpush3.bf16.msra.mxu0 %v2619_v27 }
  0x52   :  { %2315 = vmatprep.subr.bf16.mxu0 %v2638_v32 }
  0x54   :  { %2129 = vmatmul.mubr.msk.f32.gmra.mrb[4].mxu0 %vm479_vm2, %v467_v1 }
  0x55   :  { %2131 = vmatprep.mubr.msk.f32.mxu0 %vm479_vm2, %v468_v2  ;;  %2317 = vmatpush3.bf16.msra.mxu0 %v2638_v32 }
  0x56   :  { %2319 = vmatprep.subr.bf16.mxu0 %v2656_v37 }
  0x58   :  { %2132 = vmatmul.mubr.msk.f32.gmra.mrb[6].mxu0 %vm479_vm2, %v469_v3 }
  0x59   :  { %2134 = vmatprep.mubr.msk.f32.mxu0 %vm479_vm2, %v470_v4  ;;  %2321 = vmatpush3.bf16.msra.mxu0 %v2656_v37 }
  0x5a   :  { %2323 = vmatprep.subr.bf16.mxu0 %v2674_v42 }
  0x5c   :  { %2135 = vmatmul.mubr.msk.f32.gmra.mrb[8].mxu0 %vm479_vm2, %v471_v5  ;;  %v2346_v5 = vpack.c.bf16 %v1878_v63, %v1877_v62 }
  0x5d   :  { %2137 = vmatprep.mubr.msk.f32.mxu0 %vm479_vm2, %v472_v6  ;;  %2325 = vmatpush3.bf16.msra.mxu0 %v2674_v42  ;;  %v2334_v42 = vpack.c.bf16 %v1872_v36, %v1871_v35  ;;  %v1172_v35 = vld [vmem:[%s3458_s8 + $0x20] sm:$0xff]  ;;  %v1173_v36 = vld [vmem:[%s3458_s8 + $0x28] sm:$0xff] }
  0x5e   :  { %2327 = vmatprep.subr.bf16.mxu0 %v2326_v14 }
  0x60   :  { %2138 = vmatmul.mubr.msk.f32.gmra.mrb[10].mxu0 %vm479_vm2, %v473_v7 }
  0x61   :  { %2140 = vmatprep.mubr.msk.f32.mxu0 %vm479_vm2, %v474_v8  ;;  %2329 = vmatpush3.bf16.msra.mxu0 %v2326_v14 }
  0x64   :  { %2141 = vmatmul.mubr.msk.f32.gmra.mrb[12].mxu0 %vm479_vm2, %v475_v9 }
  0x65   :  { %2143 = vmatprep.mubr.msk.f32.mxu0 %vm479_vm2, %v476_v10 }
  0x68   :  { %2144 = vmatmul.mubr.msk.f32.gmra.mrb[14].mxu0 %vm479_vm2, %v477_v11 }
 0x11f   :  { %v2124_v19 = vpop.f32.mrb[0].mxu0 }
 0x120   :  { %v699_v20 = vadd.f32 %v2124_v19, %v2839_v18  ;;  %v598_v21 = vpop.f32.mrb[1].mxu0  ;;  %v1169_v19 = vld [vmem:[%s3458_s8 + $0x8] sm:$0xff] }
 0x121   :  { %v698_v22 = vadd.f32 %v2839_v18, %v598_v21  ;;  %v2912_v21 = vld [vmem:[%s3457_s7 + $0x1] ss:$0 sm:$0xff] }
 0x122   :  { %v715_v25 = vmax.f32 %v699_v20, 0.0 }
 0x123   :  { %v714_v23 = vmax.f32 %v698_v22, 0.0  ;;  %v2127_v24 = vpop.f32.mrb[2].mxu0 }
 0x124   :  { %v701_v26 = vadd.f32 %v2127_v24, %v2839_v18  ;;  %v608_v27 = vpop.f32.mrb[3].mxu0 }
 0x125   :  { %v700_v28 = vadd.f32 %v2839_v18, %v608_v27  ;;  %2170 = vmatprep.mubr.msk.f32.mxu0 %vm747_vm3, %v714_v23  ;;  %v1171_v27 = vld [vmem:[%s3458_s8 + $0x18] sm:$0xff] }
 0x126   :  { %2171 = vmatmul.mubr.msk.f32.vlgmr.msra.gmra.mrb[16].mxu0 %vm747_vm3, %v715_v25  ;;  %v717_v31 = vmax.f32 %v701_v26, 0.0  ;;  %v1170_v26 = vld [vmem:[%s3458_s8 + $0x10] sm:$0xff] }
 0x127   :  { %v716_v29 = vmax.f32 %v700_v28, 0.0  ;;  %v2130_v30 = vpop.f32.mrb[4].mxu0 }
 0x128   :  { %v703_v32 = vadd.f32 %v2130_v30, %v2839_v18  ;;  %v618_v33 = vpop.f32.mrb[5].mxu0 }
 0x129   :  { %v702_v34 = vadd.f32 %v2839_v18, %v618_v33  ;;  %2173 = vmatprep.mubr.msk.f32.mxu0 %vm747_vm3, %v716_v29  ;;  %v2358_v33 = vpack.c.bf16 %v1171_v27, %v1170_v26 }
 0x12a   :  { %2174 = vmatmul.mubr.msk.f32.gmra.mrb[18].mxu0 %vm747_vm3, %v717_v31  ;;  %v719_v39 = vmax.f32 %v703_v32, 0.0 }
 0x12b   :  { %v718_v37 = vmax.f32 %v702_v34, 0.0  ;;  %v2133_v38 = vpop.f32.mrb[6].mxu0 }
 0x12c   :  { %v705_v40 = vadd.f32 %v2133_v38, %v2839_v18  ;;  %v628_v41 = vpop.f32.mrb[7].mxu0 }
 0x12d   :  { %v704_v43 = vadd.f32 %v2839_v18, %v628_v41  ;;  %2176 = vmatprep.mubr.msk.f32.mxu1 %vm747_vm3, %v718_v37 }
 0x12e   :  { %2177 = vmatmul.mubr.msk.f32.vlgmr.msra.gmra.mrb[0].mxu1 %vm747_vm3, %v719_v39  ;;  %v721_v48 = vmax.f32 %v705_v40, 0.0 }
 0x12f   :  { %v720_v46 = vmax.f32 %v704_v43, 0.0  ;;  %v2136_v47 = vpop.f32.mrb[8].mxu0  ;;  %2333 = vmatpush3.bf16.msra.mxu1 %v2330_v17  ;;  %v2350_v17 = vpack.c.bf16 %v1880_v16, %v1879_v15 }
 0x130   :  { %v707_v49 = vadd.f32 %v2136_v47, %v2839_v18  ;;  %v638_v50 = vpop.f32.mrb[9].mxu0  ;;  %2335 = vmatprep.subr.bf16.mxu1 %v2334_v42 }
 0x131   :  { %v706_v52 = vadd.f32 %v2839_v18, %v638_v50  ;;  %2179 = vmatprep.mubr.msk.f32.mxu1 %vm747_vm3, %v720_v46 }
 0x132   :  { %2180 = vmatmul.mubr.msk.f32.gmra.mrb[2].mxu1 %vm747_vm3, %v721_v48  ;;  %v723_v57 = vmax.f32 %v707_v49, 0.0 }
 0x133   :  { %v722_v55 = vmax.f32 %v706_v52, 0.0  ;;  %v2139_v56 = vpop.f32.mrb[10].mxu0  ;;  %2337 = vmatpush3.bf16.msra.mxu1 %v2334_v42  ;;  %v2362_v42 = vpack.c.bf16 %v1173_v36, %v1172_v35 }
 0x134   :  { %v709_v58 = vadd.f32 %v2139_v56, %v2839_v18  ;;  %v648_v59 = vpop.f32.mrb[11].mxu0  ;;  %2339 = vmatprep.subr.bf16.mxu1 %v2338_v51 }
 0x135   :  { %v708_v61 = vadd.f32 %v2839_v18, %v648_v59  ;;  %2182 = vmatprep.mubr.msk.f32.mxu1 %vm747_vm3, %v722_v55 }
 0x136   :  { %2183 = vmatmul.mubr.msk.f32.gmra.mrb[4].mxu1 %vm747_vm3, %v723_v57  ;;  %v725_v2 = vmax.f32 %v709_v58, 0.0 }
 0x137   :  { %v724_v0 = vmax.f32 %v708_v61, 0.0  ;;  %v2142_v1 = vpop.f32.mrb[12].mxu0  ;;  %2341 = vmatpush3.bf16.msra.mxu1 %v2338_v51  ;;  %v2366_v51 = vpack.c.bf16 %v1175_v45, %v1174_v44 }
 0x138   :  { %v711_v3 = vadd.f32 %v2142_v1, %v2839_v18  ;;  %v658_v4 = vpop.f32.mrb[13].mxu0  ;;  %2343 = vmatprep.subr.bf16.mxu1 %v2342_v60 }
 0x139   :  { %v710_v6 = vadd.f32 %v2839_v18, %v658_v4  ;;  %2185 = vmatprep.mubr.msk.f32.mxu1 %vm747_vm3, %v724_v0 }
 0x13a   :  { %2186 = vmatmul.mubr.msk.f32.gmra.mrb[6].mxu1 %vm747_vm3, %v725_v2  ;;  %v727_v9 = vmax.f32 %v711_v3, 0.0 }
 0x13b   :  { %v726_v7 = vmax.f32 %v710_v6, 0.0  ;;  %v2145_v8 = vpop.f32.mrb[14].mxu0  ;;  %2345 = vmatpush3.bf16.msra.mxu1 %v2342_v60  ;;  %v2370_v60 = vpack.c.bf16 %v1177_v54, %v1176_v53  ;;  %v2998_v54 = vld [vmem:[%s3459_s9] ss:$0 sm:$0xff]  ;;  %s2487_s9 = smov 2  }
 0x13c   :  { %v713_v10 = vadd.f32 %v2145_v8, %v2839_v18  ;;  %v668_v11 = vpop.f32.mrb[15].mxu0  ;;  %2347 = vmatprep.subr.bf16.mxu1 %v2346_v5 }
 0x13d   :  { %v712_v12 = vadd.f32 %v2839_v18, %v668_v11  ;;  %2188 = vmatprep.mubr.msk.f32.mxu1 %vm747_vm3, %v726_v7  ;;  %v1168_v18 = vld [vmem:[%s3458_s8] sm:$0xff] }
 0x13e   :  { %2189 = vmatmul.mubr.msk.f32.gmra.mrb[8].mxu1 %vm747_vm3, %v727_v9  ;;  %v729_v14 = vmax.f32 %v713_v10, 0.0  ;;  %v2354_v20 = vpack.c.bf16 %v1169_v19, %v1168_v18  ;;  %v1178_v18 = vld [vmem:[%s3458_s8 + $0x50] sm:$0xff]  ;;  %v1179_v19 = vld [vmem:[%s3458_s8 + $0x58] sm:$0xff] }
 0x13f   :  { %v728_v13 = vmax.f32 %v712_v12, 0.0  ;;  %2349 = vmatpush3.bf16.msra.mxu1 %v2346_v5 }
 0x140   :  { %2351 = vmatprep.subr.bf16.mxu1 %v2350_v17 }
 0x141   :  { %2191 = vmatprep.mubr.msk.f32.mxu1 %vm747_vm3, %v728_v13 }
 0x142   :  { %2192 = vmatmul.mubr.msk.f32.gmra.mrb[10].mxu1 %vm747_vm3, %v729_v14 }
 0x143   :  { %2353 = vmatpush3.bf16.msra.mxu1 %v2350_v17 }
 0x144   :  { %2355 = vmatprep.subr.bf16.mxu1 %v2354_v20 }
 0x1f9   :  { %v2172_v22 = vpop.f32.mrb[16].mxu0 }
 0x1fa   :  { %v868_v23 = vadd.f32 %v2172_v22, %v2912_v21  ;;  %v862_v24 = vpop.f32.mrb[17].mxu0 }
 0x1fb   :  { %v863_v25 = vadd.f32 %v2912_v21, %v862_v24 }
 0x1fc   :  { %v942_v30 = vmax.f32 %v868_v23, 0.0 }
 0x1fd   :  { %v941_v28 = vmax.f32 %v863_v25, 0.0  ;;  %v2175_v29 = vpop.f32.mrb[18].mxu0 }
 0x1fe   :  { %v878_v31 = vadd.f32 %v2175_v29, %v2912_v21  ;;  %v872_v32 = vpop.f32.mrb[19].mxu0 }
 0x1ff   :  { %v873_v34 = vadd.f32 %v2912_v21, %v872_v32  ;;  %2218 = vmatprep.mubr.msk.f32.mxu1 %vm747_vm3, %v941_v28 }
 0x200   :  { %2219 = vmatmul.mubr.msk.f32.vlgmr.msra.gmra.mrb[12].mxu1 %vm747_vm3, %v942_v30  ;;  %v944_v39 = vmax.f32 %v878_v31, 0.0 }
 0x201   :  { %v943_v37 = vmax.f32 %v873_v34, 0.0  ;;  %v2178_v38 = vpop.f32.mrb[0].mxu1  ;;  %2357 = vmatpush3.bf16.msra.mxu1 %v2354_v20  ;;  %v2374_v20 = vpack.c.bf16 %v1179_v19, %v1178_v18 }
 0x202   :  { %v888_v40 = vadd.f32 %v2178_v38, %v2912_v21  ;;  %v882_v41 = vpop.f32.mrb[1].mxu1  ;;  %2359 = vmatprep.subr.bf16.mxu1 %v2358_v33 }
 0x203   :  { %v883_v43 = vadd.f32 %v2912_v21, %v882_v41  ;;  %2221 = vmatprep.mubr.msk.f32.mxu1 %vm747_vm3, %v943_v37 }
 0x204   :  { %2222 = vmatmul.mubr.msk.f32.gmra.mrb[14].mxu1 %vm747_vm3, %v944_v39  ;;  %v946_v48 = vmax.f32 %v888_v40, 0.0 }
 0x205   :  { %v945_v46 = vmax.f32 %v883_v43, 0.0  ;;  %v2181_v47 = vpop.f32.mrb[2].mxu1  ;;  %2361 = vmatpush3.bf16.msra.mxu1 %v2358_v33 }
 0x206   :  { %v898_v49 = vadd.f32 %v2181_v47, %v2912_v21  ;;  %v892_v50 = vpop.f32.mrb[3].mxu1  ;;  %2363 = vmatprep.subr.bf16.mxu1 %v2362_v42 }
 0x207   :  { %v893_v52 = vadd.f32 %v2912_v21, %v892_v50  ;;  %2224 = vmatprep.mubr.msk.f32.mxu1 %vm747_vm3, %v945_v46 }
 0x208   :  { %2225 = vmatmul.mubr.msk.f32.gmra.mrb[16].mxu1 %vm747_vm3, %v946_v48  ;;  %v948_v57 = vmax.f32 %v898_v49, 0.0 }
 0x209   :  { %v947_v55 = vmax.f32 %v893_v52, 0.0  ;;  %v2184_v56 = vpop.f32.mrb[4].mxu1  ;;  %2365 = vmatpush3.bf16.msra.mxu1 %v2362_v42 }
 0x20a   :  { %v908_v58 = vadd.f32 %v2184_v56, %v2912_v21  ;;  %v902_v59 = vpop.f32.mrb[5].mxu1  ;;  %2367 = vmatprep.subr.bf16.mxu1 %v2366_v51 }
 0x20b   :  { %v903_v61 = vadd.f32 %v2912_v21, %v902_v59  ;;  %2227 = vmatprep.mubr.msk.f32.mxu1 %vm747_vm3, %v947_v55 }
 0x20c   :  { %2228 = vmatmul.mubr.msk.f32.gmra.mrb[18].mxu1 %vm747_vm3, %v948_v57  ;;  %v950_v0 = vmax.f32 %v908_v58, 0.0 }
 0x20d   :  { %v949_v62 = vmax.f32 %v903_v61, 0.0  ;;  %v2187_v63 = vpop.f32.mrb[6].mxu1  ;;  %2369 = vmatpush3.bf16.msra.mxu1 %v2366_v51 }
 0x20e   :  { %v918_v1 = vadd.f32 %v2187_v63, %v2912_v21  ;;  %v912_v2 = vpop.f32.mrb[7].mxu1  ;;  %2371 = vmatprep.subr.bf16.mxu1 %v2370_v60 }
 0x20f   :  { %v913_v3 = vadd.f32 %v2912_v21, %v912_v2  ;;  %2230 = vmatprep.mubr.msk.f32.mxu1 %vm747_vm3, %v949_v62 }
 0x210   :  { %2231 = vmatmul.mubr.msk.f32.gmra.mrb[20].mxu1 %vm747_vm3, %v950_v0  ;;  %v952_v6 = vmax.f32 %v918_v1, 0.0 }
 0x211   :  { %v951_v4 = vmax.f32 %v913_v3, 0.0  ;;  %v2190_v5 = vpop.f32.mrb[8].mxu1  ;;  %2373 = vmatpush3.bf16.msra.mxu1 %v2370_v60 }
 0x212   :  { %v928_v7 = vadd.f32 %v2190_v5, %v2912_v21  ;;  %v922_v8 = vpop.f32.mrb[9].mxu1  ;;  %2375 = vmatprep.subr.bf16.mxu1 %v2374_v20 }
 0x213   :  { %v923_v9 = vadd.f32 %v2912_v21, %v922_v8  ;;  %2233 = vmatprep.mubr.msk.f32.mxu1 %vm747_vm3, %v951_v4 }
 0x214   :  { %2234 = vmatmul.mubr.msk.f32.gmra.mrb[22].mxu1 %vm747_vm3, %v952_v6  ;;  %v954_v12 = vmax.f32 %v928_v7, 0.0 }
 0x215   :  { %v953_v10 = vmax.f32 %v923_v9, 0.0  ;;  %v2193_v11 = vpop.f32.mrb[10].mxu1  ;;  %2377 = vmatpush3.bf16.msra.mxu1 %v2374_v20 }
 0x216   :  { %v938_v13 = vadd.f32 %v2193_v11, %v2912_v21  ;;  %v932_v14 = vpop.f32.mrb[11].mxu1 }
 0x217   :  { %v933_v15 = vadd.f32 %v2912_v21, %v932_v14  ;;  %2236 = vmatprep.mubr.msk.f32.mxu1 %vm747_vm3, %v953_v10  ;;  %v1881_v21 = vld [vmem:[%s3457_s7 + $0x2] ss:$0 sm:$0xff] }
 0x218   :  { %2237 = vmatmul.mubr.msk.f32.gmra.mrb[24].mxu1 %vm747_vm3, %v954_v12  ;;  %v956_v17 = vmax.f32 %v938_v13, 0.0 }
 0x219   :  { %v955_v16 = vmax.f32 %v933_v15, 0.0 }
 0x21b   :  { %2239 = vmatprep.mubr.msk.f32.mxu1 %vm747_vm3, %v955_v16 }
 0x21c   :  { %2240 = vmatmul.mubr.msk.f32.gmra.mrb[26].mxu1 %vm747_vm3, %v956_v17 }
 0x2d3   :  { %v2220_v22 = vpop.f32.mrb[12].mxu1 }
 0x2d4   :  { %v1089_v23 = vpop.f32.mrb[13].mxu1  ;;  %v1095_v25 = vadd.f32 %v2220_v22, %v1881_v21 }
 0x2d5   :  { %v1090_v24 = vadd.f32 %v1881_v21, %v1089_v23 }
 0x2d7   :  { %v2223_v26 = vpop.f32.mrb[14].mxu1  ;;  %2266 = vmatprep.mubr.msk.f32.mxu1 %vm747_vm3, %v1090_v24 }
 0x2d8   :  { %v1099_v27 = vpop.f32.mrb[15].mxu1  ;;  %2267 = vmatmul.mubr.msk.f32.vlgmr.msra.gmra.mrb[28].mxu1 %vm747_vm3, %v1095_v25  ;;  %v1105_v29 = vadd.f32 %v2223_v26, %v1881_v21 }
 0x2d9   :  { %v1100_v28 = vadd.f32 %v1881_v21, %v1099_v27 }
 0x2db   :  { %v2226_v30 = vpop.f32.mrb[16].mxu1  ;;  %2269 = vmatprep.mubr.msk.f32.mxu1 %vm747_vm3, %v1100_v28 }
 0x2dc   :  { %v1109_v31 = vpop.f32.mrb[17].mxu1  ;;  %2270 = vmatmul.mubr.msk.f32.gmra.mrb[30].mxu1 %vm747_vm3, %v1105_v29  ;;  %v1115_v33 = vadd.f32 %v2226_v30, %v1881_v21 }
 0x2dd   :  { %v1110_v32 = vadd.f32 %v1881_v21, %v1109_v31 }
 0x2df   :  { %v2229_v34 = vpop.f32.mrb[18].mxu1  ;;  %2272 = vmatprep.mubr.msk.f32.mxu1 %vm747_vm3, %v1110_v32 }
 0x2e0   :  { %v1119_v35 = vpop.f32.mrb[19].mxu1  ;;  %2273 = vmatmul.mubr.msk.f32.gmra.mrb[32].mxu1 %vm747_vm3, %v1115_v33  ;;  %v1125_v37 = vadd.f32 %v2229_v34, %v1881_v21 }
 0x2e1   :  { %v1120_v36 = vadd.f32 %v1881_v21, %v1119_v35 }
 0x2e3   :  { %v2232_v38 = vpop.f32.mrb[20].mxu1  ;;  %2275 = vmatprep.mubr.msk.f32.mxu1 %vm747_vm3, %v1120_v36 }
 0x2e4   :  { %v1129_v39 = vpop.f32.mrb[21].mxu1  ;;  %2276 = vmatmul.mubr.msk.f32.gmra.mrb[34].mxu1 %vm747_vm3, %v1125_v37  ;;  %v1135_v41 = vadd.f32 %v2232_v38, %v1881_v21 }
 0x2e5   :  { %v1130_v40 = vadd.f32 %v1881_v21, %v1129_v39 }
 0x2e7   :  { %v2235_v42 = vpop.f32.mrb[22].mxu1  ;;  %2278 = vmatprep.mubr.msk.f32.mxu1 %vm747_vm3, %v1130_v40 }
 0x2e8   :  { %v1139_v43 = vpop.f32.mrb[23].mxu1  ;;  %2279 = vmatmul.mubr.msk.f32.gmra.mrb[36].mxu1 %vm747_vm3, %v1135_v41  ;;  %v1145_v45 = vadd.f32 %v2235_v42, %v1881_v21 }
 0x2e9   :  { %v1140_v44 = vadd.f32 %v1881_v21, %v1139_v43 }
 0x2eb   :  { %v2238_v46 = vpop.f32.mrb[24].mxu1  ;;  %2281 = vmatprep.mubr.msk.f32.mxu1 %vm747_vm3, %v1140_v44 }
 0x2ec   :  { %v1149_v47 = vpop.f32.mrb[25].mxu1  ;;  %2282 = vmatmul.mubr.msk.f32.gmra.mrb[38].mxu1 %vm747_vm3, %v1145_v45  ;;  %v1155_v49 = vadd.f32 %v2238_v46, %v1881_v21 }
 0x2ed   :  { %v1150_v48 = vadd.f32 %v1881_v21, %v1149_v47 }
 0x2ef   :  { %v2241_v50 = vpop.f32.mrb[26].mxu1  ;;  %2284 = vmatprep.mubr.msk.f32.mxu1 %vm747_vm3, %v1150_v48 }
 0x2f0   :  { %v1159_v51 = vpop.f32.mrb[27].mxu1  ;;  %2285 = vmatmul.mubr.msk.f32.gmra.mrb[40].mxu1 %vm747_vm3, %v1155_v49  ;;  %v1165_v53 = vadd.f32 %v2241_v50, %v1881_v21 }
 0x2f1   :  { %v1160_v52 = vadd.f32 %v1881_v21, %v1159_v51 }
 0x2f3   :  { %2287 = vmatprep.mubr.msk.f32.mxu1 %vm747_vm3, %v1160_v52 }
 0x2f4   :  { %2288 = vmatmul.mubr.msk.f32.gmra.mrb[42].mxu1 %vm747_vm3, %v1165_v53 }
 0x3ab   :  { %v2268_v55 = vpop.f32.mrb[28].mxu1 }
 0x3ac   :  { %v3001_v56 = vadd.f32 %v2268_v55, %v2998_v54  ;;  %v1301_v57 = vpop.f32.mrb[29].mxu1 }
 0x3ad   :  { %v3004_v58 = vadd.f32 %v2998_v54, %v1301_v57 }
 0x3ae   :  { %v1429_v59 = vand.u32 2147483647, %v3001_v56  ;;  %1702 = vst.msk [vmem:[%s3460_s10 + $0x8] sm:$0xff] %vm1700_vm4, %v3001_v56  ;;  %v1381_v30 = vmax.f32 %v3001_v56, 0.0  ;;  %vm1397_vm5 = vcmp.ne.f32.partialorder %v3001_v56, %v3001_v56 }
 0x3af   :  { %v1428_v60 = vand.u32 2147483647, %v3004_v58  ;;  %v2271_v61 = vpop.f32.mrb[30].mxu1  ;;  %1701 = vst.msk [vmem:[%s3460_s10] sm:$0xff] %vm1700_vm4, %v3004_v58  ;;  %v1380_v31 = vmax.f32 %v3004_v58, 0.0  ;;  %vm1396_vm9 = vcmp.ne.f32.partialorder %v3004_v58, %v3004_v58 }
 0x3b0   :  { %v1445_v62 = vsub.f32 0.0, %v1429_v59  ;;  %v3019_v63 = vadd.f32 %v2271_v61, %v2998_v54  ;;  %v1311_v0 = vpop.f32.mrb[31].mxu1 }
 0x3b1   :  { %v3022_v1 = vadd.f32 %v2998_v54, %v1311_v0  ;;  %v1444_v3 = vsub.f32 0.0, %v1428_v60 }
 0x3b2   :  { %v1462_v2 = vmul.f32 1.442695, %v1445_v62  ;;  %v1431_v4 = vand.u32 2147483647, %v3019_v63  ;;  %1704 = vst.msk [vmem:[%s3460_s10 + $0x18] sm:$0xff] %vm1700_vm4, %v3019_v63  ;;  %v1383_v35 = vmax.f32 %v3019_v63, 0.0  ;;  %vm1399_vm6 = vcmp.ne.f32.partialorder %v3019_v63, %v3019_v63 }
 0x3b3   :  { %v1430_v5 = vand.u32 2147483647, %v3022_v1  ;;  %v2274_v6 = vpop.f32.mrb[32].mxu1  ;;  %1703 = vst.msk [vmem:[%s3460_s10 + $0x10] sm:$0xff] %vm1700_vm4, %v3022_v1  ;;  %v1382_v44 = vmax.f32 %v3022_v1, 0.0  ;;  %vm1398_vm11 = vcmp.ne.f32.partialorder %v3022_v1, %v3022_v1 }
 0x3b4   :  { %2423 = vpow2.f32 %v1462_v2  ;;  %v1447_v7 = vsub.f32 0.0, %v1431_v4  ;;  %v3037_v8 = vadd.f32 %v2274_v6, %v2998_v54  ;;  %v1321_v9 = vpop.f32.mrb[33].mxu1  ;;  %v1460_v11 = vmul.f32 1.442695, %v1444_v3 }
 0x3b5   :  { %v3040_v10 = vadd.f32 %v2998_v54, %v1321_v9  ;;  %v1446_v13 = vsub.f32 0.0, %v1430_v5 }
 0x3b6   :  { %v1466_v12 = vmul.f32 1.442695, %v1447_v7  ;;  %1706 = vst.msk [vmem:[%s3460_s10 + $0x28] sm:$0xff] %vm1700_vm4, %v3037_v8  ;;  %v1433_v18 = vand.u32 2147483647, %v3037_v8  ;;  %v1385_v48 = vmax.f32 %v3037_v8, 0.0  ;;  %vm1401_vm14 = vcmp.ne.f32.partialorder %v3037_v8, %v3037_v8 }
 0x3b7   :  { %v2277_v14 = vpop.f32.mrb[34].mxu1  ;;  %1705 = vst.msk [vmem:[%s3460_s10 + $0x20] sm:$0xff] %vm1700_vm4, %v3040_v10  ;;  %v1432_v15 = vand.u32 2147483647, %v3040_v10  ;;  %v1384_v47 = vmax.f32 %v3040_v10, 0.0  ;;  %vm1400_vm13 = vcmp.ne.f32.partialorder %v3040_v10, %v3040_v10 }
 0x3b8   :  { %2425 = vpow2.f32 %v1466_v12  ;;  %v3054_v16 = vadd.f32 %v2277_v14, %v2998_v54  ;;  %v1331_v17 = vpop.f32.mrb[35].mxu1  ;;  %v1464_v20 = vmul.f32 1.442695, %v1446_v13  ;;  %v1449_v26 = vsub.f32 0.0, %v1433_v18 }
 0x3b9   :  { %v3058_v19 = vadd.f32 %v2998_v54, %v1331_v17  ;;  %2427 = vpow2.f32 %v1460_v11  ;;  %v1448_v22 = vsub.f32 0.0, %v1432_v15 }
 0x3ba   :  { %1708 = vst.msk [vmem:[%s3460_s10 + $0x38] sm:$0xff] %vm1700_vm4, %v3054_v16  ;;  %v1435_v23 = vand.u32 2147483647, %v3054_v16  ;;  %2429 = vpow2.f32 %v1464_v20  ;;  %v1470_v41 = vmul.f32 1.442695, %v1449_v26  ;;  %v1387_v5 = vmax.f32 %v3054_v16, 0.0 }
 0x3bb   :  { %v2280_v21 = vpop.f32.mrb[36].mxu1  ;;  %1707 = vst.msk [vmem:[%s3460_s10 + $0x30] sm:$0xff] %vm1700_vm4, %v3058_v19  ;;  %v1434_v27 = vand.u32 2147483647, %v3058_v19  ;;  %vm1402_vm1 = vcmp.ne.f32.partialorder %v3058_v19, %v3058_v19  ;;  %vm1403_vm3 = vcmp.ne.f32.partialorder %v3054_v16, %v3054_v16 }
 0x3bc   :  { %v3072_v24 = vadd.f32 %v2280_v21, %v2998_v54  ;;  %v1341_v25 = vpop.f32.mrb[37].mxu1  ;;  %v1468_v36 = vmul.f32 1.442695, %v1448_v22  ;;  %v1451_v37 = vsub.f32 0.0, %v1435_v23 }
 0x3bd   :  { %v3076_v28 = vadd.f32 %v2998_v54, %v1341_v25  ;;  %v1450_v42 = vsub.f32 0.0, %v1434_v27 }
 0x3be   :  { %v3078_v29 = vpop.eup %2423  ;;  %1710 = vst.msk [vmem:[%s3460_s10 + $0x48] sm:$0xff] %vm1700_vm4, %v3072_v24  ;;  %v1437_v32 = vand.u32 2147483647, %v3072_v24  ;;  %v1474_v57 = vmul.f32 1.442695, %v1451_v37 }
 0x3bf   :  { %v2283_v33 = vpop.f32.mrb[38].mxu1  ;;  %v1501_v34 = vadd.f32 1.0, %v3078_v29  ;;  %1709 = vst.msk [vmem:[%s3460_s10 + $0x40] sm:$0xff] %vm1700_vm4, %v3076_v28  ;;  %v1436_v38 = vand.u32 2147483647, %v3076_v28  ;;  %v1504_v52 = vmul.f32 -0.5, %v3078_v29 }
 0x3c0   :  { %v3097_v39 = vadd.f32 %v2283_v33, %v2998_v54  ;;  %v1351_v40 = vpop.f32.mrb[39].mxu1  ;;  %v1453_v49 = vsub.f32 0.0, %v1437_v32  ;;  %v1472_v62 = vmul.f32 1.442695, %v1450_v42  ;;  %v1507_v26 = vand.u32 2147483647, %v3078_v29 }
 0x3c1   :  { %v3100_v43 = vadd.f32 %v2998_v54, %v1351_v40  ;;  %2431 = vlog2.f32 %v1501_v34  ;;  %v1452_v59 = vsub.f32 0.0, %v1436_v38  ;;  %v1505_v9 = vadd.f32 1.0, %v1504_v52 }
 0x3c2   :  { %v3103_v45 = vpop.eup %2425  ;;  %v1439_v46 = vand.u32 2147483647, %v3097_v39  ;;  %1712 = vst.msk [vmem:[%s3460_s10 + $0x58] sm:$0xff] %vm1700_vm4, %v3097_v39  ;;  %2433 = vpow2.f32 %v1468_v36  ;;  %v1478_v6 = vmul.f32 1.442695, %v1453_v49  ;;  %v1386_v32 = vmax.f32 %v3058_v19, 0.0 }
 0x3c3   :  { %v1438_v50 = vand.u32 2147483647, %v3100_v43  ;;  %v2286_v51 = vpop.f32.mrb[40].mxu1  ;;  %v1519_v53 = vadd.f32 1.0, %v3103_v45  ;;  %1711 = vst.msk [vmem:[%s3460_s10 + $0x50] sm:$0xff] %vm1700_vm4, %v3100_v43  ;;  %v3121_v55 = vpop.eup %2427  ;;  %2435 = vpow2.f32 %v1470_v41  ;;  %v1522_v11 = vmul.f32 -0.5, %v3103_v45 }
 0x3c4   :  { %v3124_v60 = vadd.f32 %v2286_v51, %v2998_v54  ;;  %v1361_v61 = vpop.f32.mrb[41].mxu1  ;;  %v1455_v0 = vsub.f32 0.0, %v1439_v46  ;;  %v1492_v12 = vadd.f32 1.0, %v3121_v55  ;;  %v1476_v13 = vmul.f32 1.442695, %v1452_v59  ;;  %v3147_v18 = vpop.eup %2429 }
 0x3c5   :  { %v3127_v2 = vadd.f32 %v2998_v54, %v1361_v61  ;;  %v1454_v3 = vsub.f32 0.0, %v1438_v50  ;;  %2437 = vlog2.f32 %v1519_v53  ;;  %v1506_v27 = vmul.f32 %v3078_v29, %v1505_v9 }
 0x3c6   :  { %v1441_v4 = vand.u32 2147483647, %v3124_v60  ;;  %1714 = vst.msk [vmem:[%s3460_s10 + $0x68] sm:$0xff] %vm1700_vm4, %v3124_v60  ;;  %2439 = vpow2.f32 %v1474_v57  ;;  %v1482_v20 = vmul.f32 1.442695, %v1455_v0  ;;  %v1495_v37 = vmul.f32 -0.5, %v3121_v55 }
 0x3c7   :  { %v2289_v7 = vpop.f32.mrb[42].mxu1  ;;  %1713 = vst.msk [vmem:[%s3460_s10 + $0x60] sm:$0xff] %vm1700_vm4, %v3127_v2  ;;  %v1440_v14 = vand.u32 2147483647, %v3127_v2  ;;  %2441 = vpow2.f32 %v1472_v62  ;;  %v1525_v36 = vand.u32 2147483647, %v3103_v45 }
 0x3c8   :  { %v3145_v15 = vadd.f32 %v2289_v7, %v2998_v54  ;;  %v1371_v17 = vpop.f32.mrb[43].mxu1  ;;  %v1457_v21 = vsub.f32 0.0, %v1441_v4  ;;  %v1480_v23 = vmul.f32 1.442695, %v1454_v3  ;;  %2443 = vlog2.f32 %v1492_v12 }
 0x3c9   :  { %v3150_v22 = vadd.f32 %v2998_v54, %v1371_v17  ;;  %2445 = vpow2.f32 %v1478_v6  ;;  %v1523_v54 = vadd.f32 1.0, %v1522_v11  ;;  %v1456_v34 = vsub.f32 0.0, %v1440_v14 }
 0x3ca   :  { %v1443_v25 = vand.u32 2147483647, %v3145_v15  ;;  %1716 = vst.msk [vmem:[%s3460_s10 + $0x78] sm:$0xff] %vm1700_vm4, %v3145_v15  ;;  %2447 = vpow2.f32 %v1476_v13  ;;  %v1486_v38 = vmul.f32 1.442695, %v1457_v21  ;;  %v1510_v29 = vadd.f32 1.0, %v3147_v18 }
 0x3cb   :  { %1715 = vst.msk [vmem:[%s3460_s10 + $0x70] sm:$0xff] %vm1700_vm4, %v3150_v22  ;;  %v2432_v33 = vpop.eup %2431  ;;  %2449 = vpow2.f32 %v1482_v20  ;;  %v1442_v46 = vand.u32 2147483647, %v3150_v22  ;;  %vm1508_vm7 = vcmp.lt.f32.partialorder %v1507_v26, 0.0004427343  ;;  %v1524_v51 = vmul.f32 %v3103_v45, %v1523_v54 }
 0x3cc   :  { %v1503_v40 = vmul.f32 0.6931472, %v2432_v33  ;;  %v3173_v41 = vpop.eup %2433  ;;  %2451 = vpow2.f32 %v1480_v23  ;;  %v1459_v42 = vsub.f32 0.0, %v1443_v25  ;;  %v1389_v52 = vmax.f32 %v3072_v24, 0.0 }
 0x3cd   :  { %v3176_v49 = vpop.eup %2435  ;;  %2453 = vlog2.f32 %v1510_v29  ;;  %v1484_v57 = vmul.f32 1.442695, %v1456_v34  ;;  %v1496_v61 = vadd.f32 1.0, %v1495_v37  ;;  %v1513_v62 = vmul.f32 -0.5, %v3147_v18 }
 0x3ce   :  { %v1509_v50 = vsel %vm1508_vm7, %v1506_v27, %v1503_v40  ;;  %2455 = vpow2.f32 %v1486_v38  ;;  %vm1526_vm8 = vcmp.lt.f32.partialorder %v1525_v36, 0.0004427343  ;;  %v1528_v3 = vadd.f32 1.0, %v3173_v41 }
 0x3cf   :  { %v2438_v53 = vpop.eup %2437  ;;  %v1637_v59 = vadd.f32 %v1509_v50, %v1381_v30  ;;  %v1490_v4 = vmul.f32 1.442695, %v1459_v42  ;;  %v1458_v6 = vsub.f32 0.0, %v1442_v46  ;;  %v1498_v7 = vand.u32 2147483647, %v3121_v55 }
 0x3d0   :  { %v1521_v0 = vmul.f32 0.6931472, %v2438_v53  ;;  %v3186_v45 = vpop.eup %2439  ;;  %2457 = vlog2.f32 %v1528_v3  ;;  %v1537_v13 = vadd.f32 1.0, %v3176_v49  ;;  %v1497_v20 = vmul.f32 %v3121_v55, %v1496_v61 }
 0x3d1   :  { %v1653_v30 = vsel %vm1397_vm5, %v3001_v56, %v1637_v59  ;;  %v3193_v9 = vpop.eup %2441  ;;  %v1514_v21 = vadd.f32 1.0, %v1513_v62  ;;  %v1516_v23 = vand.u32 2147483647, %v3147_v18  ;;  %v1531_v27 = vmul.f32 -0.5, %v3173_v41 }
 0x3d2   :  { %v1669_v11 = vmul.f32 0.99, %v1653_v30  ;;  %v1527_v12 = vsel %vm1526_vm8, %v1524_v51, %v1521_v0  ;;  %v2444_v14 = vpop.eup %2443  ;;  %2459 = vlog2.f32 %v1537_v13  ;;  %vm1499_vm10 = vcmp.lt.f32.partialorder %v1498_v7, 0.0004427343 }
 0x3d3   :  { %v1639_v17 = vadd.f32 %v1527_v12, %v1383_v35  ;;  %v3200_v25 = vpop.eup %2445  ;;  %v1494_v26 = vmul.f32 0.6931472, %v2444_v14  ;;  %2461 = vpow2.f32 %v1484_v57  ;;  %v1546_v55 = vadd.f32 1.0, %v3193_v9 }
 0x3d4   :  { %v1685_v56 = vadd.f32 0.01, %v1669_v11  ;;  %v3203_v54 = vpop.eup %2447  ;;  %2463 = vpow2.f32 %v1490_v4  ;;  %v1540_v37 = vmul.f32 -0.5, %v3176_v49  ;;  %v1488_v40 = vmul.f32 1.442695, %v1458_v6 }
 0x3d5   :  { %v1655_v35 = vsel %vm1399_vm6, %v3019_v63, %v1639_v17  ;;  %v3212_v33 = vpop.eup %2449  ;;  %v1500_v36 = vsel %vm1499_vm10, %v1497_v20, %v1494_v26  ;;  %vm3220_vm12 = vcmp.lt.f32.partialorder %v1516_v23, 0.0004427343  ;;  %2465 = vlog2.f32 %v1546_v55 }
 0x3d6   :  { %1735 = vrot.lane.b32.xlu0 %v1685_v56, %s2487_s9  ;;  %v1671_v34 = vmul.f32 0.99, %v1655_v35  ;;  %v3216_v38 = vpop.eup %2451  ;;  %v1636_v63 = vadd.f32 %v1500_v36, %v1380_v31  ;;  %v1515_v50 = vmul.f32 %v3147_v18, %v1514_v21  ;;  %v1532_v51 = vadd.f32 1.0, %v1531_v27 }
 0x3d7   :  { %v2454_v42 = vpop.eup %2453  ;;  %v1555_v53 = vadd.f32 1.0, %v3186_v45  ;;  %v1534_v31 = vand.u32 2147483647, %v3173_v41  ;;  %v1549_v61 = vmul.f32 -0.5, %v3193_v9  ;;  %v1541_v0 = vadd.f32 1.0, %v1540_v37 }
 0x3d8   :  { %v1687_v46 = vadd.f32 0.01, %v1671_v34  ;;  %v1652_v57 = vsel %vm1396_vm9, %v3004_v58, %v1636_v63  ;;  %v1512_v59 = vmul.f32 0.6931472, %v2454_v42  ;;  %v3234_v62 = vpop.eup %2455  ;;  %v1543_v3 = vand.u32 2147483647, %v3176_v49 }
 0x3d9   :  { %v1668_v18 = vmul.f32 0.99, %v1652_v57  ;;  %2467 = vlog2.f32 %v1555_v53  ;;  %v1558_v4 = vmul.f32 -0.5, %v3186_v45  ;;  %v1564_v6 = vadd.f32 1.0, %v3203_v54 }
 0x3da   :  { %1739 = vrot.lane.b32.xlu1 %v1687_v46, %s2487_s9  ;;  %2469 = vpow2.f32 %v1488_v40  ;;  %v1518_v58 = vsel %vm3220_vm12, %v1515_v50, %v1512_v59  ;;  %v2458_v30 = vpop.eup %2457  ;;  %v1533_v12 = vmul.f32 %v3173_v41, %v1532_v51  ;;  %v1552_v13 = vand.u32 2147483647, %v3193_v9 }
 0x3db   :  { %v1684_v7 = vadd.f32 0.01, %v1668_v18  ;;  %v1638_v11 = vadd.f32 %v1518_v58, %v1382_v44  ;;  %v1530_v14 = vmul.f32 0.6931472, %v2458_v30  ;;  %v1550_v17 = vadd.f32 1.0, %v1549_v61 }
 0x3dc   :  { %2471 = vlog2.f32 %v1564_v6  ;;  %v1573_v20 = vadd.f32 1.0, %v3200_v25  ;;  %v2460_v21 = vpop.eup %2459  ;;  %vm1535_vm15 = vcmp.lt.f32.partialorder %v1534_v31, 0.0004427343  ;;  %v1542_v44 = vmul.f32 %v3176_v49, %v1541_v0 }
 0x3dd   :  { %1733 = vrot.lane.b32.xlu0 %v1684_v7, %s2487_s9  ;;  %v1654_v23 = vsel %vm1398_vm11, %v3022_v1, %v1638_v11  ;;  %vm3255_vm0 = vcmp.lt.f32.partialorder %v1543_v3, 0.0004427343  ;;  %v3261_v56 = vpop.eup %2461  ;;  %v1536_v27 = vsel %vm1535_vm15, %v1533_v12, %v1530_v14  ;;  %v1539_v35 = vmul.f32 0.6931472, %v2460_v21 }
 0x3de   :  { %v1670_v26 = vmul.f32 0.99, %v1654_v23  ;;  %v1559_v55 = vadd.f32 1.0, %v1558_v4  ;;  %v3263_v34 = vpop.eup %2463  ;;  %v1640_v1 = vadd.f32 %v1536_v27, %v1384_v47  ;;  %vm3267_vm2 = vcmp.lt.f32.partialorder %v1552_v13, 0.0004427343 }
 0x3df   :  { %v1567_v36 = vmul.f32 -0.5, %v3203_v54  ;;  %2473 = vlog2.f32 %v1573_v20  ;;  %v2466_v37 = vpop.eup %2465  ;;  %v1545_v63 = vsel %vm3255_vm0, %v1542_v44, %v1539_v35  ;;  %v1551_v29 = vmul.f32 %v3193_v9, %v1550_v17 }
 0x3e0   :  { %v1686_v40 = vadd.f32 0.01, %v1670_v26  ;;  %v1561_v42 = vand.u32 2147483647, %v3186_v45  ;;  %v1656_v47 = vsel %vm1400_vm13, %v3040_v10, %v1640_v1  ;;  %v1641_v46 = vadd.f32 %v1545_v63, %v1385_v48 }
 0x3e1   :  { %v1548_v50 = vmul.f32 0.6931472, %v2466_v37  ;;  %v1576_v51 = vmul.f32 -0.5, %v3200_v25  ;;  %v1672_v53 = vmul.f32 0.99, %v1656_v47  ;;  %v1560_v9 = vmul.f32 %v3186_v45, %v1559_v55 }
 0x3e2   :  { %1737 = vrot.lane.b32.xlu1 %v1686_v40, %s2487_s9  ;;  %v1570_v57 = vand.u32 2147483647, %v3203_v54  ;;  %v1582_v59 = vadd.f32 1.0, %v3216_v38  ;;  %v1657_v10 = vsel %vm1401_vm14, %v3037_v8, %v1641_v46  ;;  %v1568_v61 = vadd.f32 1.0, %v1567_v36 }
 0x3e3   :  { %v2468_v31 = vpop.eup %2467  ;;  %v1554_v48 = vsel %vm3267_vm2, %v1551_v29, %v1548_v50  ;;  %v1591_v18 = vadd.f32 1.0, %v3212_v33  ;;  %v1688_v3 = vadd.f32 0.01, %v1672_v53  ;;  %v1673_v45 = vmul.f32 0.99, %v1657_v10 }
 0x3e4   :  { %v3296_v0 = vpop.eup %2469  ;;  %v1642_v58 = vadd.f32 %v1554_v48, %v1386_v32  ;;  %v1557_v4 = vmul.f32 0.6931472, %v2468_v31  ;;  %vm1562_vm4 = vcmp.lt.f32.partialorder %v1561_v42, 0.0004427343  ;;  %v1577_v6 = vadd.f32 1.0, %v1576_v51 }
 0x3e5   :  { %v1579_v30 = vand.u32 2147483647, %v3200_v25  ;;  %2475 = vlog2.f32 %v1582_v59  ;;  %1741 = vrot.lane.b32.xlu0 %v1688_v3, %s2487_s9  ;;  %v1689_v7 = vadd.f32 0.01, %v1673_v45  ;;  %v1569_v17 = vmul.f32 %v3203_v54, %v1568_v61 }
 0x3e6   :  { %v2472_v8 = vpop.eup %2471  ;;  %v1658_v11 = vsel %vm1402_vm1, %v3058_v19, %v1642_v58  ;;  %v1563_v12 = vsel %vm1562_vm4, %v1560_v9, %v1557_v4  ;;  %2477 = vlog2.f32 %v1591_v18  ;;  %v1388_v20 = vmax.f32 %v3076_v28, 0.0 }
 0x3e7   :  { %v1674_v13 = vmul.f32 0.99, %v1658_v11  ;;  %v1643_v32 = vadd.f32 %v1563_v12, %v1387_v5  ;;  %v1566_v14 = vmul.f32 0.6931472, %v2472_v8  ;;  %1743 = vrot.lane.b32.xlu1 %v1689_v7, %s2487_s9  ;;  %vm1571_vm5 = vcmp.lt.f32.partialorder %v1570_v57, 0.0004427343 }
 0x3e8   :  { %v1585_v21 = vmul.f32 -0.5, %v3216_v38  ;;  %v1600_v23 = vadd.f32 1.0, %v3261_v56  ;;  %v1594_v26 = vmul.f32 -0.5, %v3212_v33  ;;  %v1578_v55 = vmul.f32 %v3200_v25, %v1577_v6 }
 0x3e9   :  { %v2474_v44 = vpop.eup %2473  ;;  %v1690_v19 = vadd.f32 0.01, %v1674_v13  ;;  %v1659_v41 = vsel %vm1403_vm3, %v3054_v16, %v1643_v32  ;;  %v1572_v5 = vsel %vm1571_vm5, %v1569_v17, %v1566_v14  ;;  %vm1404_vm6 = vcmp.ne.f32.partialorder %v3076_v28, %v3076_v28 }
 0x3ea   :  { %v1675_v54 = vmul.f32 0.99, %v1659_v41  ;;  %v1644_v27 = vadd.f32 %v1572_v5, %v1388_v20  ;;  %v1575_v35 = vmul.f32 0.6931472, %v2474_v44  ;;  %vm1580_vm7 = vcmp.lt.f32.partialorder %v1579_v30, 0.0004427343 }
 0x3eb   :  { %1745 = vrot.lane.b32.xlu0 %v1690_v19, %s2487_s9  ;;  %v1588_v1 = vand.u32 2147483647, %v3216_v38  ;;  %2479 = vlog2.f32 %v1600_v23  ;;  %v1586_v37 = vadd.f32 1.0, %v1585_v21  ;;  %v1595_v29 = vadd.f32 1.0, %v1594_v26 }
 0x3ec   :  { %v1691_v49 = vadd.f32 0.01, %v1675_v54  ;;  %v1660_v16 = vsel %vm1404_vm6, %v3076_v28, %v1644_v27  ;;  %v1581_v36 = vsel %vm1580_vm7, %v1578_v55, %v1575_v35  ;;  %v1597_v25 = vand.u32 2147483647, %v3212_v33 }
 0x3ed   :  { %v1676_v40 = vmul.f32 0.99, %v1660_v16  ;;  %v1645_v63 = vadd.f32 %v1581_v36, %v1389_v52  ;;  %vm1405_vm8 = vcmp.ne.f32.partialorder %v3072_v24, %v3072_v24  ;;  %v1390_v42 = vmax.f32 %v3100_v43, 0.0 }
 0x3ee   :  { %1747 = vrot.lane.b32.xlu1 %v1691_v49, %s2487_s9  ;;  %v1603_v47 = vmul.f32 -0.5, %v3261_v56  ;;  %v1609_v28 = vadd.f32 1.0, %v3234_v62  ;;  %vm3334_vm9 = vcmp.lt.f32.partialorder %v1588_v1, 0.0004427343  ;;  %v1391_v53 = vmax.f32 %v3097_v39, 0.0 }
 0x3ef   :  { %v2476_v46 = vpop.eup %2475  ;;  %v1692_v50 = vadd.f32 0.01, %v1676_v40  ;;  %v1661_v51 = vsel %vm1405_vm8, %v3072_v24, %v1645_v63  ;;  %v1587_v31 = vmul.f32 %v3216_v38, %v1586_v37  ;;  %v1596_v48 = vmul.f32 %v3212_v33, %v1595_v29 }
 0x3f0   :  { %v2478_v9 = vpop.eup %2477  ;;  %v1677_v57 = vmul.f32 0.99, %v1661_v51  ;;  %v1584_v59 = vmul.f32 0.6931472, %v2476_v46  ;;  %2481 = vlog2.f32 %v1609_v28  ;;  %vm1598_vm10 = vcmp.lt.f32.partialorder %v1597_v25, 0.0004427343 }
 0x3f1   :  { %1749 = vrot.lane.b32.xlu0 %v1692_v50, %s2487_s9  ;;  %v1593_v10 = vmul.f32 0.6931472, %v2478_v9  ;;  %v1618_v24 = vadd.f32 1.0, %v3296_v0  ;;  %v1604_v3 = vadd.f32 1.0, %v1603_v47  ;;  %v1606_v45 = vand.u32 2147483647, %v3261_v56 }
 0x3f2   :  { %v1693_v61 = vadd.f32 0.01, %v1677_v57  ;;  %v1590_v18 = vsel %vm3334_vm9, %v1587_v31, %v1584_v59  ;;  %v1612_v38 = vmul.f32 -0.5, %v3234_v62  ;;  %vm1406_vm11 = vcmp.ne.f32.partialorder %v3100_v43, %v3100_v43 }
 0x3f3   :  { %v1646_v58 = vadd.f32 %v1590_v18, %v1390_v42  ;;  %v1599_v4 = vsel %vm1598_vm10, %v1596_v48, %v1593_v10  ;;  %2483 = vlog2.f32 %v1618_v24  ;;  %vm1407_vm12 = vcmp.ne.f32.partialorder %v3097_v39, %v3097_v39 }
 0x3f4   :  { %1751 = vrot.lane.b32.xlu1 %v1693_v61, %s2487_s9  ;;  %v1647_v33 = vadd.f32 %v1599_v4, %v1391_v53  ;;  %v1392_v8 = vmax.f32 %v3127_v2, 0.0  ;;  %v1621_v7 = vmul.f32 -0.5, %v3296_v0  ;;  %v1627_v11 = vadd.f32 1.0, %v3263_v34 }
 0x3f5   :  { %v2480_v6 = vpop.eup %2479  ;;  %v1662_v30 = vsel %vm1406_vm11, %v3100_v43, %v1646_v58  ;;  %v1605_v14 = vmul.f32 %v3261_v56, %v1604_v3  ;;  %vm1607_vm13 = vcmp.lt.f32.partialorder %v1606_v45, 0.0004427343  ;;  %v1613_v20 = vadd.f32 1.0, %v1612_v38 }
 0x3f6   :  { %v1678_v12 = vmul.f32 0.99, %v1662_v30  ;;  %v1663_v13 = vsel %vm1407_vm12, %v3097_v39, %v1647_v33  ;;  %v1602_v32 = vmul.f32 0.6931472, %v2480_v6  ;;  %2485 = vlog2.f32 %v1627_v11 }
 0x3f7   :  { %v1679_v17 = vmul.f32 0.99, %v1663_v13  ;;  %v1615_v43 = vand.u32 2147483647, %v3234_v62  ;;  %v1622_v41 = vadd.f32 1.0, %v1621_v7  ;;  %vm1408_vm14 = vcmp.ne.f32.partialorder %v3127_v2, %v3127_v2 }
 0x3f8   :  { %v1694_v21 = vadd.f32 0.01, %v1678_v12  ;;  %v1608_v23 = vsel %vm1607_vm13, %v1605_v14, %v1602_v32  ;;  %v1630_v39 = vmul.f32 -0.5, %v3263_v34  ;;  %v1614_v54 = vmul.f32 %v3234_v62, %v1613_v20 }
 0x3f9   :  { %v1695_v44 = vadd.f32 0.01, %v1679_v17  ;;  %v1648_v19 = vadd.f32 %v1608_v23, %v1392_v8  ;;  %v1624_v27 = vand.u32 2147483647, %v3296_v0  ;;  %v1393_v55 = vmax.f32 %v3124_v60, 0.0 }
 0x3fa   :  { %v2482_v5 = vpop.eup %2481  ;;  %1753 = vrot.lane.b32.xlu0 %v1694_v21, %s2487_s9  ;;  %vm1616_vm15 = vcmp.lt.f32.partialorder %v1615_v43, 0.0004427343  ;;  %v1623_v16 = vmul.f32 %v3296_v0, %v1622_v41  ;;  %v1631_v63 = vadd.f32 1.0, %v1630_v39  ;;  %vm1409_vm0 = vcmp.ne.f32.partialorder %v3124_v60, %v3124_v60 }
 0x3fb   :  { %1755 = vrot.lane.b32.xlu1 %v1695_v44, %s2487_s9  ;;  %v1664_v56 = vsel %vm1408_vm14, %v3127_v2, %v1648_v19  ;;  %v1611_v26 = vmul.f32 0.6931472, %v2482_v5  ;;  %v1394_v2 = vmax.f32 %v3150_v22, 0.0  ;;  %vm1625_vm1 = vcmp.lt.f32.partialorder %v1624_v27, 0.0004427343 }
 0x3fc   :  { %v1680_v35 = vmul.f32 0.99, %v1664_v56  ;;  %v1633_v62 = vand.u32 2147483647, %v3263_v34  ;;  %vm1410_vm2 = vcmp.ne.f32.partialorder %v3150_v22, %v3150_v22  ;;  %v1632_v46 = vmul.f32 %v3263_v34, %v1631_v63 }
 0x3fd   :  { %v2484_v1 = vpop.eup %2483  ;;  %v1617_v49 = vsel %vm1616_vm15, %v1614_v54, %v1611_v26  ;;  %v1395_v52 = vmax.f32 %v3145_v15, 0.0  ;;  %vm1411_vm4 = vcmp.ne.f32.partialorder %v3145_v15, %v3145_v15  ;;  %vm1781_vm5 = vcmask 48160  }
 0x3fe   :  { %v1696_v36 = vadd.f32 0.01, %v1680_v35  ;;  %v1649_v37 = vadd.f32 %v1617_v49, %v1393_v55  ;;  %v1620_v40 = vmul.f32 0.6931472, %v2484_v1  ;;  %vm1634_vm3 = vcmp.lt.f32.partialorder %v1633_v62, 0.0004427343 }
 0x400   :  { %1757 = vrot.lane.b32.xlu0 %v1696_v36, %s2487_s9  ;;  %v1665_v29 = vsel %vm1409_vm0, %v3124_v60, %v1649_v37  ;;  %v1626_v25 = vsel %vm1625_vm1, %v1623_v16, %v1620_v40  ;;  %v2486_v42 = vpop.eup %2485 }
 0x401   :  { %v1681_v47 = vmul.f32 0.99, %v1665_v29  ;;  %v1650_v0 = vadd.f32 %v1626_v25, %v1394_v2  ;;  %v1629_v28 = vmul.f32 0.6931472, %v2486_v42 }
 0x403   :  { %v1697_v50 = vadd.f32 0.01, %v1681_v47  ;;  %v1666_v51 = vsel %vm1410_vm2, %v3150_v22, %v1650_v0  ;;  %v1635_v9 = vsel %vm1634_vm3, %v1632_v46, %v1629_v28 }
 0x404   :  { %v1682_v53 = vmul.f32 0.99, %v1666_v51  ;;  %v1651_v60 = vadd.f32 %v1635_v9, %v1395_v52 }
 0x405   :  { %1759 = vrot.lane.b32.xlu1 %v1697_v50, %s2487_s9 }
 0x406   :  { %v1698_v57 = vadd.f32 0.01, %v1682_v53  ;;  %v1667_v59 = vsel %vm1411_vm4, %v3145_v15, %v1651_v60 }
 0x407   :  { %v1683_v34 = vmul.f32 0.99, %v1667_v59 }
 0x408   :  { %1761 = vrot.lane.b32.xlu0 %v1698_v57, %s2487_s9 }
 0x409   :  { %v1699_v31 = vadd.f32 0.01, %v1683_v34 }
 0x40b   :  { %1763 = vrot.lane.b32.xlu1 %v1699_v31, %s2487_s9 }
 0x448   :  { %v1736_v22 = vpop.permute.xlu0 %1735 }
 0x449   :  { %1783 = vst.msk [vmem:[%s3460_s10 + $0x8] sm:$0xff] %vm1781_vm5, %v1736_v22 }
 0x44c   :  { %v1740_v10 = vpop.permute.xlu1 %1739 }
 0x44d   :  { %1785 = vst.msk [vmem:[%s3460_s10 + $0x18] sm:$0xff] %vm1781_vm5, %v1740_v10 }
 0x44f   :  { %v1734_v15 = vpop.permute.xlu0 %1733 }
 0x450   :  { %1782 = vst.msk [vmem:[%s3460_s10] sm:$0xff] %vm1781_vm5, %v1734_v15 }
 0x454   :  { %v1738_v48 = vpop.permute.xlu1 %1737 }
 0x455   :  { %1784 = vst.msk [vmem:[%s3460_s10 + $0x10] sm:$0xff] %vm1781_vm5, %v1738_v48 }
 0x457   :  { %v1742_v24 = vpop.permute.xlu0 %1741 }
 0x458   :  { %1786 = vst.msk [vmem:[%s3460_s10 + $0x20] sm:$0xff] %vm1781_vm5, %v1742_v24 }
 0x459   :  { %v1744_v61 = vpop.permute.xlu1 %1743 }
 0x45a   :  { %1787 = vst.msk [vmem:[%s3460_s10 + $0x28] sm:$0xff] %vm1781_vm5, %v1744_v61 }
 0x45d   :  { %v1746_v18 = vpop.permute.xlu0 %1745 }
 0x45e   :  { %1788 = vst.msk [vmem:[%s3460_s10 + $0x30] sm:$0xff] %vm1781_vm5, %v1746_v18 }
 0x460   :  { %v1748_v3 = vpop.permute.xlu1 %1747 }
 0x461   :  { %1789 = vst.msk [vmem:[%s3460_s10 + $0x38] sm:$0xff] %vm1781_vm5, %v1748_v3 }
 0x463   :  { %v1750_v45 = vpop.permute.xlu0 %1749 }
 0x464   :  { %1790 = vst.msk [vmem:[%s3460_s10 + $0x40] sm:$0xff] %vm1781_vm5, %v1750_v45 }
 0x466   :  { %v1752_v58 = vpop.permute.xlu1 %1751 }
 0x467   :  { %1791 = vst.msk [vmem:[%s3460_s10 + $0x48] sm:$0xff] %vm1781_vm5, %v1752_v58 }
 0x46c   :  { %v1754_v4 = vpop.permute.xlu0 %1753 }
 0x46d   :  { %1792 = vst.msk [vmem:[%s3460_s10 + $0x50] sm:$0xff] %vm1781_vm5, %v1754_v4  ;;  %v1756_v38 = vpop.permute.xlu1 %1755 }
 0x46e   :  { %1793 = vst.msk [vmem:[%s3460_s10 + $0x58] sm:$0xff] %vm1781_vm5, %v1756_v38 }
 0x472   :  { %v1758_v33 = vpop.permute.xlu0 %1757 }
 0x473   :  { %1794 = vst.msk [vmem:[%s3460_s10 + $0x60] sm:$0xff] %vm1781_vm5, %v1758_v33 }
 0x477   :  { %v1760_v6 = vpop.permute.xlu1 %1759 }
 0x478   :  { %1795 = vst.msk [vmem:[%s3460_s10 + $0x68] sm:$0xff] %vm1781_vm5, %v1760_v6 }
 0x47a   :  { %v1762_v30 = vpop.permute.xlu0 %1761 }
 0x47b   :  { %1796 = vst.msk [vmem:[%s3460_s10 + $0x70] sm:$0xff] %vm1781_vm5, %v1762_v30 }
 0x47d   :  { %v1764_v8 = vpop.permute.xlu1 %1763 }
 0x47e   :  { %1797 = vst.msk [vmem:[%s3460_s10 + $0x78] sm:$0xff] %vm1781_vm5, %v1764_v8 }

</bundles_post_ra>
